<compile_context>
chip_gen: v6e
topology: v6e:2x2x1
jax: 0.10.0
libtpu: 0.0.40
codegen_flags: <defaults>
</compile_context>

<pallas_src>
import jax
import jax.numpy as jnp
from jax.experimental import pallas as pl
from jax.experimental.pallas import tpu as pltpu

BATCH = 2
SEQ = 8
INPUT_DIMS = 16
HIDDEN = 32
STATIC_DIM = 1      # consistent with `static_input.unsqueeze(-1).expand(B, S, -1)`
N_LAYERS = 2


# ------------------------------ fused kernel ---------------------------------

def _fused_kernel(x_ref, static_ref, bsel_ref, bselt_ref,
                  wih1_ref, b1_ref, wrec_ref, b2_ref,
                  w1_ref, bm1_ref, w2_ref, bm2_ref, w3_ref, bm3_ref,
                  w4r_ref, b4_ref,
                  out_ref, wts_ref, comb_scr):
    f32 = jnp.float32
    B = out_ref.shape[0]
    H = wrec_ref.shape[0]
    S = x_ref.shape[0] // B

    # static channel of the combined (lstm_out | static) rows: written once.
    comb_scr[:, H:H + 1] = static_ref[...]

    # ---- hoisted layer-1 input projection: one (S*B,Din)@(Din,4H) matmul ----
    xg1 = (jnp.dot(x_ref[...], wih1_ref[...].astype(f32),
                   preferred_element_type=f32) + b1_ref[...])            # (S*B, 4H)

    # fused recurrent weights [whh1 | wih2 | whh2]: DMA'd as bf16, upcast ONCE,
    # kept live across the fully unrolled wavefront loop.
    wrec = wrec_ref[...].astype(f32)                                     # (H, 12H)
    b2 = b2_ref[...]

    def cell(gates, c):
        # one full-width sigmoid + one tanh over all 4H gate lanes (EUP has slack),
        # then slice i/f/g/o from the activated results.
        sg = jax.nn.sigmoid(gates)
        tg = jnp.tanh(gates)
        c_new = sg[:, H:2 * H] * c + sg[:, 0:H] * tg[:, 2 * H:3 * H]
        h_new = sg[:, 3 * H:4 * H] * jnp.tanh(c_new)
        return h_new, c_new

    zero = jnp.zeros((B, H), f32)
    h1, c1, h2, c2 = zero, zero, zero, zero

    # ---- wavefront over both LSTM layers (unrolled; h/c stay in vregs) ----
    # step s: layer-1 computes time step s, layer-2 computes time step s-1; both feed
    # off ONE (2B,H)@(H,12H) MXU push using the pre-update h1/h2.
    for s in range(S + 1):
        if s >= 1:
            lhs = jnp.concatenate([h1, h2], axis=0)                      # [h1_{s-1}; h2_{s-2}]
            rec = jnp.dot(lhs, wrec, preferred_element_type=f32)         # (2B, 12H)
        if s < S:                                                        # layer 1, time s
            g1 = xg1[s * B:(s + 1) * B, :]
            if s >= 1:
                g1 = g1 + rec[0:B, 0:4 * H]                              # + h1_{s-1} @ whh1
            h1, c1 = cell(g1, c1)
        if s >= 1:                                                       # layer 2, time s-1
            g2 = rec[0:B, 4 * H:8 * H] + rec[B:2 * B, 8 * H:12 * H] + b2
            h2, c2 = cell(g2, c2)
            comb_scr[(s - 1) * B:s * B, 0:H] = h2                        # time-major rows

    # ---- attention MLP over all B*S rows at once (time-major straight through) ----
    comb = comb_scr[...]                                                 # (S*B, H+1)
    p = jnp.maximum(jnp.dot(comb, w1_ref[...].astype(f32),
                            preferred_element_type=f32) + bm1_ref[...], 0.0)   # (S*B, 512)
    p = jnp.maximum(jnp.dot(p, w2_ref[...].astype(f32),
                            preferred_element_type=f32) + bm2_ref[...], 0.0)   # (S*B, 256)
    p = jnp.maximum(jnp.dot(p, w3_ref[...].astype(f32),
                            preferred_element_type=f32) + bm3_ref[...], 0.0)   # (S*B, 128)
    # final (.,128)@(128,1) as a VPU multiply + lane reduction (keeps the MXU free)
    energy = jnp.sum(p * w4r_ref[...], axis=-1, keepdims=True) + b4_ref[...]   # (S*B, 1)

    # ---- per-batch softmax over the sequence, kept time-major via the 0/1 batch
    #      selection matrix bsel (row t*B+b -> one-hot of b).  Softmax is shift
    #      invariant, so one global max suffices for stability.
    bsel = bsel_ref[...]                                                 # (S*B, B)
    ex = jnp.exp(energy - jnp.max(energy, axis=0, keepdims=True))        # (S*B, 1)
    denom = jnp.sum(ex * bsel, axis=0, keepdims=True)                    # (1, B)
    denom_col = jnp.sum(bsel * denom, axis=-1, keepdims=True)            # (S*B, 1)
    w_full = ex * pl.reciprocal(denom_col, approx=True)                  # (S*B, 1)

    # ---- attention-weighted sum per batch: one (B,S*B)@(S*B,H+1) selection matmul;
    #      the static output channel falls out exactly as in the reference.
    out_ref[...] = jnp.dot(bselt_ref[...], w_full * comb,
                           preferred_element_type=f32)                   # ONE (B,H+1) store
    wts_ref[...] = w_full                                                # ONE (S*B,1) store


# --------------------------------- wrapper -----------------------------------

def lstm_network_forward(state, static_input, params):
    """state: (B, S, input_dims) batch_first; static_input: (B, 1).

    Returns (outputs, weights): outputs (B, H+1), weights (B, S, 1) — matching
    SelfAttention.forward's (outputs, weights) with the intended seq-axis semantics."""
    B, S, DIN = state.shape
    (wih1, whh1, b1), (wih2, whh2, b2) = params["lstm"]
    (w1, bm1), (w2, bm2), (w3, bm3), (w4, b4) = params["mlp"]
    H = whh1.shape[0]
    D = H + static_input.shape[-1]
    bf16 = jnp.bfloat16

    # tiny (<2 KB) layout plumbing; all heavy math happens inside the fused kernel
    x2d = jnp.swapaxes(state, 0, 1).reshape(S * B, DIN)          # time-major rows t*B + b
    static_col = jnp.tile(static_input, (S, 1))                  # (S*B, 1): row t*B+b -> b
    bsel = jnp.tile(jnp.eye(B, dtype=jnp.float32), (S, 1))       # (S*B, B) batch one-hots
    bselt = bsel.T                                               # (B, S*B)
    wrec = jnp.concatenate([whh1, wih2, whh2], axis=1)           # (H, 12H) fused recurrent
    w4r = w4.reshape(1, -1)                                      # (1, 128) row for VPU reduce

    vmem = pl.BlockSpec(memory_space=pltpu.MemorySpace.VMEM)
    out, wts = pl.pallas_call(
        _fused_kernel,
        out_shape=(jax.ShapeDtypeStruct((B, D), jnp.float32),
                   jax.ShapeDtypeStruct((S * B, 1), jnp.float32)),
        in_specs=[vmem] * 16,
        out_specs=(vmem, vmem),
        scratch_shapes=[pltpu.VMEM((S * B, D), jnp.float32)],    # combined (h2 | static)
    )(x2d, static_col, bsel, bselt,
      wih1.astype(bf16), b1, wrec.astype(bf16), b2,
      w1.astype(bf16), bm1, w2.astype(bf16), bm2, w3.astype(bf16), bm3,
      w4r, b4)
    # weights come back time-major (S*B, 1); regroup to (B, S, 1) outside the kernel
    return out, jnp.swapaxes(wts.reshape(S, B, 1), 0, 1)


# ------------------------------ parameter init --------------------------------

def init_params(key):
    H, DIN, SD = HIDDEN, INPUT_DIMS, STATIC_DIM
    D = H + SD
    keys = iter(jax.random.split(key, 32))

    def u(shape, bound):
        return jax.random.uniform(next(keys), shape, jnp.float32, -bound, bound)

    def uw(shape, bound):
        # Weight matrices are kept bf16-representable so the wrapper's bf16 weight DMA
        # (halves HBM traffic / VMEM footprint) is lossless vs. the f32 reference.
        return u(shape, bound).astype(jnp.bfloat16).astype(jnp.float32)

    k = 1.0 / float(H) ** 0.5
    lstm = []
    in_dim = DIN
    for _ in range(N_LAYERS):
        w_ih = uw((in_dim, 4 * H), k)                # stored transposed vs PyTorch
        w_hh = uw((H, 4 * H), k)
        b = u((1, 4 * H), k) + u((1, 4 * H), k)      # b_ih + b_hh folded together
        lstm.append((w_ih, w_hh, b))
        in_dim = H

    dims = [D, 512, 256, 128, 1]
    mlp = []
    for i in range(4):
        bound = 1.0 / float(dims[i]) ** 0.5
        mlp.append((uw((dims[i], dims[i + 1]), bound), u((1, dims[i + 1]), bound)))
    return {"lstm": lstm, "mlp": mlp}


# ------------------------------ pure-JAX reference -----------------------------

def _lstm_layer_ref(x, w_ih, w_hh, b):
    B = x.shape[0]
    H = w_hh.shape[0]

    def step(carry, x_t):
        h, c = carry
        gates = x_t @ w_ih + h @ w_hh + b
        i = jax.nn.sigmoid(gates[:, :H])
        f = jax.nn.sigmoid(gates[:, H:2 * H])
        g = jnp.tanh(gates[:, 2 * H:3 * H])
        o = jax.nn.sigmoid(gates[:, 3 * H:])
        c = f * c + i * g
        h = o * jnp.tanh(c)
        return (h, c), h

    init = (jnp.zeros((B, H), jnp.float32), jnp.zeros((B, H), jnp.float32))
    _, hs = jax.lax.scan(step, init, jnp.swapaxes(x, 0, 1))
    return jnp.swapaxes(hs, 0, 1)


def reference_forward(state, static_input, params):
    x = state
    for (w_ih, w_hh, b) in params["lstm"]:
        x = _lstm_layer_ref(x, w_ih, w_hh, b)
    B, S, _ = x.shape
    sd = static_input.shape[-1]
    comb = jnp.concatenate(
        [x, jnp.broadcast_to(static_input[:, None, :], (B, S, sd))], axis=2)
    (w1, b1), (w2, b2), (w3, b3), (w4, b4) = params["mlp"]
    h = jax.nn.relu(comb @ w1 + b1)
    h = jax.nn.relu(h @ w2 + b2)
    h = jax.nn.relu(h @ w3 + b3)
    energy = h @ w4 + b4                     # (B, S, 1)
    w = jax.nn.softmax(energy, axis=1)
    return jnp.sum(comb * w, axis=1), w      # (B, H+sd), (B, S, 1)


# ----------------------------------- main --------------------------------------

if __name__ == "__main__":
    key = jax.random.PRNGKey(0)
    k_state, k_static, k_params = jax.random.split(key, 3)

    state = jax.random.normal(k_state, (BATCH, SEQ, INPUT_DIMS), jnp.float32)
    static_input = jax.random.normal(k_static, (BATCH, STATIC_DIM), jnp.float32)
    params = init_params(k_params)

    fwd = jax.jit(lstm_network_forward)
    out, wts = fwd(state, static_input, params)
    out, wts = jax.block_until_ready((out, wts))

    assert out.shape == (BATCH, HIDDEN + STATIC_DIM), out.shape
    assert wts.shape == (BATCH, SEQ, 1), wts.shape

    ref_out, ref_w = reference_forward(state, static_input, params)
    # kernel and reference share identical (bf16-representable) weights; remaining
    # differences are MXU default-precision truncation and the approx reciprocal.
    assert jnp.allclose(out, ref_out, atol=2e-2, rtol=2e-2), (
        float(jnp.max(jnp.abs(out - ref_out))))
    assert jnp.allclose(wts, ref_w, atol=2e-2, rtol=2e-2), (
        float(jnp.max(jnp.abs(wts - ref_w))))
    print("KERNEL_OK")
</pallas_src>

<mosaic_0001>
module attributes {stable_mosaic.version = 11 : i64} {
  func.func @_fused_kernel(%arg0: memref<16x16xf32, #tpu.memory_space<vmem>>, %arg1: memref<16x1xf32, #tpu.memory_space<vmem>>, %arg2: memref<16x2xf32, #tpu.memory_space<vmem>>, %arg3: memref<2x16xf32, #tpu.memory_space<vmem>>, %arg4: memref<16x128xbf16, #tpu.memory_space<vmem>>, %arg5: memref<1x128xf32, #tpu.memory_space<vmem>>, %arg6: memref<32x384xbf16, #tpu.memory_space<vmem>>, %arg7: memref<1x128xf32, #tpu.memory_space<vmem>>, %arg8: memref<33x512xbf16, #tpu.memory_space<vmem>>, %arg9: memref<1x512xf32, #tpu.memory_space<vmem>>, %arg10: memref<512x256xbf16, #tpu.memory_space<vmem>>, %arg11: memref<1x256xf32, #tpu.memory_space<vmem>>, %arg12: memref<256x128xbf16, #tpu.memory_space<vmem>>, %arg13: memref<1x128xf32, #tpu.memory_space<vmem>>, %arg14: memref<1x128xf32, #tpu.memory_space<vmem>>, %arg15: memref<1x1xf32, #tpu.memory_space<vmem>>, %arg16: memref<2x33xf32, #tpu.memory_space<vmem>>, %arg17: memref<16x1xf32, #tpu.memory_space<vmem>>, %arg18: memref<16x33xf32, #tpu.memory_space<vmem>>) attributes {dimension_semantics = [], scalar_prefetch = 0 : i64, scratch_operands = 1 : i64, tpu.core_type = #tpu.core_type<tc>} {
    %c0 = arith.constant 0 : index
    %c0_0 = arith.constant 0 : index
    %0 = vector.load %arg1[%c0, %c0_0] : memref<16x1xf32, #tpu.memory_space<vmem>>, vector<16x1xf32>
    %c0_1 = arith.constant 0 : index
    %c32 = arith.constant 32 : index
    %1 = vector.load %arg18[%c0_1, %c32] : memref<16x33xf32, #tpu.memory_space<vmem>>, vector<16x1xf32>
    tpu.vector_store %arg18[%c0_1, %c32], %0 {strides = array<i32>} : memref<16x33xf32, #tpu.memory_space<vmem>>, vector<16x1xf32>,
    %c0_2 = arith.constant 0 : index
    %c0_3 = arith.constant 0 : index
    %2 = vector.load %arg0[%c0_2, %c0_3] : memref<16x16xf32, #tpu.memory_space<vmem>>, vector<16x16xf32>
    %c0_4 = arith.constant 0 : index
    %c0_5 = arith.constant 0 : index
    %3 = vector.load %arg4[%c0_4, %c0_5] : memref<16x128xbf16, #tpu.memory_space<vmem>>, vector<16x128xbf16>
    %4 = arith.extf %3 : vector<16x128xbf16> to vector<16x128xf32>
    %cst = arith.constant dense<0.000000e+00> : vector<16x128xf32>
    %5 = tpu.matmul %2, %4, %cst {dimension_numbers = #tpu.dot_dimension_numbers<[1], [0], [0], [1], [0, 0, 1, 1], [], []>} : vector<16x16xf32>, vector<16x128xf32>, vector<16x128xf32> -> vector<16x128xf32>
    %c0_6 = arith.constant 0 : index
    %c0_7 = arith.constant 0 : index
    %6 = vector.load %arg5[%c0_6, %c0_7] : memref<1x128xf32, #tpu.memory_space<vmem>>, vector<1x128xf32>
    %7 = vector.broadcast %6 : vector<1x128xf32> to vector<16x128xf32>
    %8 = arith.addf %5, %7 : vector<16x128xf32>
    %c0_8 = arith.constant 0 : index
    %c0_9 = arith.constant 0 : index
    %9 = vector.load %arg6[%c0_8, %c0_9] : memref<32x384xbf16, #tpu.memory_space<vmem>>, vector<32x384xbf16>
    %10 = arith.extf %9 : vector<32x384xbf16> to vector<32x384xf32>
    %c0_10 = arith.constant 0 : index
    %c0_11 = arith.constant 0 : index
    %11 = vector.load %arg7[%c0_10, %c0_11] : memref<1x128xf32, #tpu.memory_space<vmem>>, vector<1x128xf32>
    %cst_12 = arith.constant 0.000000e+00 : f32
    %12 = vector.broadcast %cst_12 : f32 to vector<2x32xf32>
    %13 = vector.extract_strided_slice %8 {offsets = [0, 0], sizes = [2, 128], strides = [1, 1]} : vector<16x128xf32> to vector<2x128xf32>
    %14 = arith.negf %13 : vector<2x128xf32>
    %15 = math.exp %14 : vector<2x128xf32>
    %cst_13 = arith.constant 1.000000e+00 : f32
    %16 = vector.broadcast %cst_13 : f32 to vector<2x128xf32>
    %17 = arith.addf %16, %15 : vector<2x128xf32>
    %18 = arith.divf %16, %17 : vector<2x128xf32>
    %19 = math.tanh %13 : vector<2x128xf32>
    %20 = vector.extract_strided_slice %18 {offsets = [0, 32], sizes = [2, 32], strides = [1, 1]} : vector<2x128xf32> to vector<2x32xf32>
    %21 = arith.mulf %20, %12 : vector<2x32xf32>
    %22 = vector.extract_strided_slice %18 {offsets = [0, 0], sizes = [2, 32], strides = [1, 1]} : vector<2x128xf32> to vector<2x32xf32>
    %23 = vector.extract_strided_slice %19 {offsets = [0, 64], sizes = [2, 32], strides = [1, 1]} : vector<2x128xf32> to vector<2x32xf32>
    %24 = arith.mulf %22, %23 : vector<2x32xf32>
    %25 = arith.addf %21, %24 : vector<2x32xf32>
    %26 = vector.extract_strided_slice %18 {offsets = [0, 96], sizes = [2, 32], strides = [1, 1]} : vector<2x128xf32> to vector<2x32xf32>
    %27 = math.tanh %25 : vector<2x32xf32>
    %28 = arith.mulf %26, %27 : vector<2x32xf32>
    %29 = tpu.concatenate %28, %12 in 0 : vector<2x32xf32>, vector<2x32xf32> -> vector<4x32xf32>
    %cst_14 = arith.constant dense<0.000000e+00> : vector<4x384xf32>
    %30 = tpu.matmul %29, %10, %cst_14 {dimension_numbers = #tpu.dot_dimension_numbers<[1], [0], [0], [1], [0, 0, 1, 1], [], []>} : vector<4x32xf32>, vector<32x384xf32>, vector<4x384xf32> -> vector<4x384xf32>
    %31 = vector.extract_strided_slice %8 {offsets = [2, 0], sizes = [2, 128], strides = [1, 1]} : vector<16x128xf32> to vector<2x128xf32>
    %32 = vector.extract_strided_slice %30 {offsets = [0, 0], sizes = [2, 128], strides = [1, 1]} : vector<4x384xf32> to vector<2x128xf32>
    %33 = arith.addf %31, %32 : vector<2x128xf32>
    %34 = arith.negf %33 : vector<2x128xf32>
    %35 = math.exp %34 : vector<2x128xf32>
    %cst_15 = arith.constant 1.000000e+00 : f32
    %36 = vector.broadcast %cst_15 : f32 to vector<2x128xf32>
    %37 = arith.addf %36, %35 : vector<2x128xf32>
    %38 = arith.divf %36, %37 : vector<2x128xf32>
    %39 = math.tanh %33 : vector<2x128xf32>
    %40 = vector.extract_strided_slice %38 {offsets = [0, 32], sizes = [2, 32], strides = [1, 1]} : vector<2x128xf32> to vector<2x32xf32>
    %41 = arith.mulf %40, %25 : vector<2x32xf32>
    %42 = vector.extract_strided_slice %38 {offsets = [0, 0], sizes = [2, 32], strides = [1, 1]} : vector<2x128xf32> to vector<2x32xf32>
    %43 = vector.extract_strided_slice %39 {offsets = [0, 64], sizes = [2, 32], strides = [1, 1]} : vector<2x128xf32> to vector<2x32xf32>
    %44 = arith.mulf %42, %43 : vector<2x32xf32>
    %45 = arith.addf %41, %44 : vector<2x32xf32>
    %46 = vector.extract_strided_slice %38 {offsets = [0, 96], sizes = [2, 32], strides = [1, 1]} : vector<2x128xf32> to vector<2x32xf32>
    %47 = math.tanh %45 : vector<2x32xf32>
    %48 = arith.mulf %46, %47 : vector<2x32xf32>
    %49 = vector.extract_strided_slice %30 {offsets = [0, 128], sizes = [2, 128], strides = [1, 1]} : vector<4x384xf32> to vector<2x128xf32>
    %50 = vector.extract_strided_slice %30 {offsets = [2, 256], sizes = [2, 128], strides = [1, 1]} : vector<4x384xf32> to vector<2x128xf32>
    %51 = arith.addf %49, %50 : vector<2x128xf32>
    %52 = vector.broadcast %11 : vector<1x128xf32> to vector<2x128xf32>
    %53 = arith.addf %51, %52 : vector<2x128xf32>
    %54 = arith.negf %53 : vector<2x128xf32>
    %55 = math.exp %54 : vector<2x128xf32>
    %cst_16 = arith.constant 1.000000e+00 : f32
    %56 = vector.broadcast %cst_16 : f32 to vector<2x128xf32>
    %57 = arith.addf %56, %55 : vector<2x128xf32>
    %58 = arith.divf %56, %57 : vector<2x128xf32>
    %59 = math.tanh %53 : vector<2x128xf32>
    %60 = vector.extract_strided_slice %58 {offsets = [0, 32], sizes = [2, 32], strides = [1, 1]} : vector<2x128xf32> to vector<2x32xf32>
    %61 = arith.mulf %60, %12 : vector<2x32xf32>
    %62 = vector.extract_strided_slice %58 {offsets = [0, 0], sizes = [2, 32], strides = [1, 1]} : vector<2x128xf32> to vector<2x32xf32>
    %63 = vector.extract_strided_slice %59 {offsets = [0, 64], sizes = [2, 32], strides = [1, 1]} : vector<2x128xf32> to vector<2x32xf32>
    %64 = arith.mulf %62, %63 : vector<2x32xf32>
    %65 = arith.addf %61, %64 : vector<2x32xf32>
    %66 = vector.extract_strided_slice %58 {offsets = [0, 96], sizes = [2, 32], strides = [1, 1]} : vector<2x128xf32> to vector<2x32xf32>
    %67 = math.tanh %65 : vector<2x32xf32>
    %68 = arith.mulf %66, %67 : vector<2x32xf32>
    %c0_17 = arith.constant 0 : index
    %c0_18 = arith.constant 0 : index
    %69 = vector.load %arg18[%c0_17, %c0_18] : memref<16x33xf32, #tpu.memory_space<vmem>>, vector<2x32xf32>
    tpu.vector_store %arg18[%c0_17, %c0_18], %68 {strides = array<i32>} : memref<16x33xf32, #tpu.memory_space<vmem>>, vector<2x32xf32>,
    %70 = tpu.concatenate %48, %68 in 0 : vector<2x32xf32>, vector<2x32xf32> -> vector<4x32xf32>
    %cst_19 = arith.constant dense<0.000000e+00> : vector<4x384xf32>
    %71 = tpu.matmul %70, %10, %cst_19 {dimension_numbers = #tpu.dot_dimension_numbers<[1], [0], [0], [1], [0, 0, 1, 1], [], []>} : vector<4x32xf32>, vector<32x384xf32>, vector<4x384xf32> -> vector<4x384xf32>
    %72 = vector.extract_strided_slice %8 {offsets = [4, 0], sizes = [2, 128], strides = [1, 1]} : vector<16x128xf32> to vector<2x128xf32>
    %73 = vector.extract_strided_slice %71 {offsets = [0, 0], sizes = [2, 128], strides = [1, 1]} : vector<4x384xf32> to vector<2x128xf32>
    %74 = arith.addf %72, %73 : vector<2x128xf32>
    %75 = arith.negf %74 : vector<2x128xf32>
    %76 = math.exp %75 : vector<2x128xf32>
    %cst_20 = arith.constant 1.000000e+00 : f32
    %77 = vector.broadcast %cst_20 : f32 to vector<2x128xf32>
    %78 = arith.addf %77, %76 : vector<2x128xf32>
    %79 = arith.divf %77, %78 : vector<2x128xf32>
    %80 = math.tanh %74 : vector<2x128xf32>
    %81 = vector.extract_strided_slice %79 {offsets = [0, 32], sizes = [2, 32], strides = [1, 1]} : vector<2x128xf32> to vector<2x32xf32>
    %82 = arith.mulf %81, %45 : vector<2x32xf32>
    %83 = vector.extract_strided_slice %79 {offsets = [0, 0], sizes = [2, 32], strides = [1, 1]} : vector<2x128xf32> to vector<2x32xf32>
    %84 = vector.extract_strided_slice %80 {offsets = [0, 64], sizes = [2, 32], strides = [1, 1]} : vector<2x128xf32> to vector<2x32xf32>
    %85 = arith.mulf %83, %84 : vector<2x32xf32>
    %86 = arith.addf %82, %85 : vector<2x32xf32>
    %87 = vector.extract_strided_slice %79 {offsets = [0, 96], sizes = [2, 32], strides = [1, 1]} : vector<2x128xf32> to vector<2x32xf32>
    %88 = math.tanh %86 : vector<2x32xf32>
    %89 = arith.mulf %87, %88 : vector<2x32xf32>
    %90 = vector.extract_strided_slice %71 {offsets = [0, 128], sizes = [2, 128], strides = [1, 1]} : vector<4x384xf32> to vector<2x128xf32>
    %91 = vector.extract_strided_slice %71 {offsets = [2, 256], sizes = [2, 128], strides = [1, 1]} : vector<4x384xf32> to vector<2x128xf32>
    %92 = arith.addf %90, %91 : vector<2x128xf32>
    %93 = vector.broadcast %11 : vector<1x128xf32> to vector<2x128xf32>
    %94 = arith.addf %92, %93 : vector<2x128xf32>
    %95 = arith.negf %94 : vector<2x128xf32>
    %96 = math.exp %95 : vector<2x128xf32>
    %cst_21 = arith.constant 1.000000e+00 : f32
    %97 = vector.broadcast %cst_21 : f32 to vector<2x128xf32>
    %98 = arith.addf %97, %96 : vector<2x128xf32>
    %99 = arith.divf %97, %98 : vector<2x128xf32>
    %100 = math.tanh %94 : vector<2x128xf32>
    %101 = vector.extract_strided_slice %99 {offsets = [0, 32], sizes = [2, 32], strides = [1, 1]} : vector<2x128xf32> to vector<2x32xf32>
    %102 = arith.mulf %101, %65 : vector<2x32xf32>
    %103 = vector.extract_strided_slice %99 {offsets = [0, 0], sizes = [2, 32], strides = [1, 1]} : vector<2x128xf32> to vector<2x32xf32>
    %104 = vector.extract_strided_slice %100 {offsets = [0, 64], sizes = [2, 32], strides = [1, 1]} : vector<2x128xf32> to vector<2x32xf32>
    %105 = arith.mulf %103, %104 : vector<2x32xf32>
    %106 = arith.addf %102, %105 : vector<2x32xf32>
    %107 = vector.extract_strided_slice %99 {offsets = [0, 96], sizes = [2, 32], strides = [1, 1]} : vector<2x128xf32> to vector<2x32xf32>
    %108 = math.tanh %106 : vector<2x32xf32>
    %109 = arith.mulf %107, %108 : vector<2x32xf32>
    %c2 = arith.constant 2 : index
    %c0_22 = arith.constant 0 : index
    %110 = vector.load %arg18[%c2, %c0_22] : memref<16x33xf32, #tpu.memory_space<vmem>>, vector<2x32xf32>
    tpu.vector_store %arg18[%c2, %c0_22], %109 {strides = array<i32>} : memref<16x33xf32, #tpu.memory_space<vmem>>, vector<2x32xf32>,
    %111 = tpu.concatenate %89, %109 in 0 : vector<2x32xf32>, vector<2x32xf32> -> vector<4x32xf32>
    %cst_23 = arith.constant dense<0.000000e+00> : vector<4x384xf32>
    %112 = tpu.matmul %111, %10, %cst_23 {dimension_numbers = #tpu.dot_dimension_numbers<[1], [0], [0], [1], [0, 0, 1, 1], [], []>} : vector<4x32xf32>, vector<32x384xf32>, vector<4x384xf32> -> vector<4x384xf32>
    %113 = vector.extract_strided_slice %8 {offsets = [6, 0], sizes = [2, 128], strides = [1, 1]} : vector<16x128xf32> to vector<2x128xf32>
    %114 = vector.extract_strided_slice %112 {offsets = [0, 0], sizes = [2, 128], strides = [1, 1]} : vector<4x384xf32> to vector<2x128xf32>
    %115 = arith.addf %113, %114 : vector<2x128xf32>
    %116 = arith.negf %115 : vector<2x128xf32>
    %117 = math.exp %116 : vector<2x128xf32>
    %cst_24 = arith.constant 1.000000e+00 : f32
    %118 = vector.broadcast %cst_24 : f32 to vector<2x128xf32>
    %119 = arith.addf %118, %117 : vector<2x128xf32>
    %120 = arith.divf %118, %119 : vector<2x128xf32>
    %121 = math.tanh %115 : vector<2x128xf32>
    %122 = vector.extract_strided_slice %120 {offsets = [0, 32], sizes = [2, 32], strides = [1, 1]} : vector<2x128xf32> to vector<2x32xf32>
    %123 = arith.mulf %122, %86 : vector<2x32xf32>
    %124 = vector.extract_strided_slice %120 {offsets = [0, 0], sizes = [2, 32], strides = [1, 1]} : vector<2x128xf32> to vector<2x32xf32>
    %125 = vector.extract_strided_slice %121 {offsets = [0, 64], sizes = [2, 32], strides = [1, 1]} : vector<2x128xf32> to vector<2x32xf32>
    %126 = arith.mulf %124, %125 : vector<2x32xf32>
    %127 = arith.addf %123, %126 : vector<2x32xf32>
    %128 = vector.extract_strided_slice %120 {offsets = [0, 96], sizes = [2, 32], strides = [1, 1]} : vector<2x128xf32> to vector<2x32xf32>
    %129 = math.tanh %127 : vector<2x32xf32>
    %130 = arith.mulf %128, %129 : vector<2x32xf32>
    %131 = vector.extract_strided_slice %112 {offsets = [0, 128], sizes = [2, 128], strides = [1, 1]} : vector<4x384xf32> to vector<2x128xf32>
    %132 = vector.extract_strided_slice %112 {offsets = [2, 256], sizes = [2, 128], strides = [1, 1]} : vector<4x384xf32> to vector<2x128xf32>
    %133 = arith.addf %131, %132 : vector<2x128xf32>
    %134 = vector.broadcast %11 : vector<1x128xf32> to vector<2x128xf32>
    %135 = arith.addf %133, %134 : vector<2x128xf32>
    %136 = arith.negf %135 : vector<2x128xf32>
    %137 = math.exp %136 : vector<2x128xf32>
    %cst_25 = arith.constant 1.000000e+00 : f32
    %138 = vector.broadcast %cst_25 : f32 to vector<2x128xf32>
    %139 = arith.addf %138, %137 : vector<2x128xf32>
    %140 = arith.divf %138, %139 : vector<2x128xf32>
    %141 = math.tanh %135 : vector<2x128xf32>
    %142 = vector.extract_strided_slice %140 {offsets = [0, 32], sizes = [2, 32], strides = [1, 1]} : vector<2x128xf32> to vector<2x32xf32>
    %143 = arith.mulf %142, %106 : vector<2x32xf32>
    %144 = vector.extract_strided_slice %140 {offsets = [0, 0], sizes = [2, 32], strides = [1, 1]} : vector<2x128xf32> to vector<2x32xf32>
    %145 = vector.extract_strided_slice %141 {offsets = [0, 64], sizes = [2, 32], strides = [1, 1]} : vector<2x128xf32> to vector<2x32xf32>
    %146 = arith.mulf %144, %145 : vector<2x32xf32>
    %147 = arith.addf %143, %146 : vector<2x32xf32>
    %148 = vector.extract_strided_slice %140 {offsets = [0, 96], sizes = [2, 32], strides = [1, 1]} : vector<2x128xf32> to vector<2x32xf32>
    %149 = math.tanh %147 : vector<2x32xf32>
    %150 = arith.mulf %148, %149 : vector<2x32xf32>
    %c4 = arith.constant 4 : index
    %c0_26 = arith.constant 0 : index
    %151 = vector.load %arg18[%c4, %c0_26] : memref<16x33xf32, #tpu.memory_space<vmem>>, vector<2x32xf32>
    tpu.vector_store %arg18[%c4, %c0_26], %150 {strides = array<i32>} : memref<16x33xf32, #tpu.memory_space<vmem>>, vector<2x32xf32>,
    %152 = tpu.concatenate %130, %150 in 0 : vector<2x32xf32>, vector<2x32xf32> -> vector<4x32xf32>
    %cst_27 = arith.constant dense<0.000000e+00> : vector<4x384xf32>
    %153 = tpu.matmul %152, %10, %cst_27 {dimension_numbers = #tpu.dot_dimension_numbers<[1], [0], [0], [1], [0, 0, 1, 1], [], []>} : vector<4x32xf32>, vector<32x384xf32>, vector<4x384xf32> -> vector<4x384xf32>
    %154 = vector.extract_strided_slice %8 {offsets = [8, 0], sizes = [2, 128], strides = [1, 1]} : vector<16x128xf32> to vector<2x128xf32>
    %155 = vector.extract_strided_slice %153 {offsets = [0, 0], sizes = [2, 128], strides = [1, 1]} : vector<4x384xf32> to vector<2x128xf32>
    %156 = arith.addf %154, %155 : vector<2x128xf32>
    %157 = arith.negf %156 : vector<2x128xf32>
    %158 = math.exp %157 : vector<2x128xf32>
    %cst_28 = arith.constant 1.000000e+00 : f32
    %159 = vector.broadcast %cst_28 : f32 to vector<2x128xf32>
    %160 = arith.addf %159, %158 : vector<2x128xf32>
    %161 = arith.divf %159, %160 : vector<2x128xf32>
    %162 = math.tanh %156 : vector<2x128xf32>
    %163 = vector.extract_strided_slice %161 {offsets = [0, 32], sizes = [2, 32], strides = [1, 1]} : vector<2x128xf32> to vector<2x32xf32>
    %164 = arith.mulf %163, %127 : vector<2x32xf32>
    %165 = vector.extract_strided_slice %161 {offsets = [0, 0], sizes = [2, 32], strides = [1, 1]} : vector<2x128xf32> to vector<2x32xf32>
    %166 = vector.extract_strided_slice %162 {offsets = [0, 64], sizes = [2, 32], strides = [1, 1]} : vector<2x128xf32> to vector<2x32xf32>
    %167 = arith.mulf %165, %166 : vector<2x32xf32>
    %168 = arith.addf %164, %167 : vector<2x32xf32>
    %169 = vector.extract_strided_slice %161 {offsets = [0, 96], sizes = [2, 32], strides = [1, 1]} : vector<2x128xf32> to vector<2x32xf32>
    %170 = math.tanh %168 : vector<2x32xf32>
    %171 = arith.mulf %169, %170 : vector<2x32xf32>
    %172 = vector.extract_strided_slice %153 {offsets = [0, 128], sizes = [2, 128], strides = [1, 1]} : vector<4x384xf32> to vector<2x128xf32>
    %173 = vector.extract_strided_slice %153 {offsets = [2, 256], sizes = [2, 128], strides = [1, 1]} : vector<4x384xf32> to vector<2x128xf32>
    %174 = arith.addf %172, %173 : vector<2x128xf32>
    %175 = vector.broadcast %11 : vector<1x128xf32> to vector<2x128xf32>
    %176 = arith.addf %174, %175 : vector<2x128xf32>
    %177 = arith.negf %176 : vector<2x128xf32>
    %178 = math.exp %177 : vector<2x128xf32>
    %cst_29 = arith.constant 1.000000e+00 : f32
    %179 = vector.broadcast %cst_29 : f32 to vector<2x128xf32>
    %180 = arith.addf %179, %178 : vector<2x128xf32>
    %181 = arith.divf %179, %180 : vector<2x128xf32>
    %182 = math.tanh %176 : vector<2x128xf32>
    %183 = vector.extract_strided_slice %181 {offsets = [0, 32], sizes = [2, 32], strides = [1, 1]} : vector<2x128xf32> to vector<2x32xf32>
    %184 = arith.mulf %183, %147 : vector<2x32xf32>
    %185 = vector.extract_strided_slice %181 {offsets = [0, 0], sizes = [2, 32], strides = [1, 1]} : vector<2x128xf32> to vector<2x32xf32>
    %186 = vector.extract_strided_slice %182 {offsets = [0, 64], sizes = [2, 32], strides = [1, 1]} : vector<2x128xf32> to vector<2x32xf32>
    %187 = arith.mulf %185, %186 : vector<2x32xf32>
    %188 = arith.addf %184, %187 : vector<2x32xf32>
    %189 = vector.extract_strided_slice %181 {offsets = [0, 96], sizes = [2, 32], strides = [1, 1]} : vector<2x128xf32> to vector<2x32xf32>
    %190 = math.tanh %188 : vector<2x32xf32>
    %191 = arith.mulf %189, %190 : vector<2x32xf32>
    %c6 = arith.constant 6 : index
    %c0_30 = arith.constant 0 : index
    %192 = vector.load %arg18[%c6, %c0_30] : memref<16x33xf32, #tpu.memory_space<vmem>>, vector<2x32xf32>
    tpu.vector_store %arg18[%c6, %c0_30], %191 {strides = array<i32>} : memref<16x33xf32, #tpu.memory_space<vmem>>, vector<2x32xf32>,
    %193 = tpu.concatenate %171, %191 in 0 : vector<2x32xf32>, vector<2x32xf32> -> vector<4x32xf32>
    %cst_31 = arith.constant dense<0.000000e+00> : vector<4x384xf32>
    %194 = tpu.matmul %193, %10, %cst_31 {dimension_numbers = #tpu.dot_dimension_numbers<[1], [0], [0], [1], [0, 0, 1, 1], [], []>} : vector<4x32xf32>, vector<32x384xf32>, vector<4x384xf32> -> vector<4x384xf32>
    %195 = vector.extract_strided_slice %8 {offsets = [10, 0], sizes = [2, 128], strides = [1, 1]} : vector<16x128xf32> to vector<2x128xf32>
    %196 = vector.extract_strided_slice %194 {offsets = [0, 0], sizes = [2, 128], strides = [1, 1]} : vector<4x384xf32> to vector<2x128xf32>
    %197 = arith.addf %195, %196 : vector<2x128xf32>
    %198 = arith.negf %197 : vector<2x128xf32>
    %199 = math.exp %198 : vector<2x128xf32>
    %cst_32 = arith.constant 1.000000e+00 : f32
    %200 = vector.broadcast %cst_32 : f32 to vector<2x128xf32>
    %201 = arith.addf %200, %199 : vector<2x128xf32>
    %202 = arith.divf %200, %201 : vector<2x128xf32>
    %203 = math.tanh %197 : vector<2x128xf32>
    %204 = vector.extract_strided_slice %202 {offsets = [0, 32], sizes = [2, 32], strides = [1, 1]} : vector<2x128xf32> to vector<2x32xf32>
    %205 = arith.mulf %204, %168 : vector<2x32xf32>
    %206 = vector.extract_strided_slice %202 {offsets = [0, 0], sizes = [2, 32], strides = [1, 1]} : vector<2x128xf32> to vector<2x32xf32>
    %207 = vector.extract_strided_slice %203 {offsets = [0, 64], sizes = [2, 32], strides = [1, 1]} : vector<2x128xf32> to vector<2x32xf32>
    %208 = arith.mulf %206, %207 : vector<2x32xf32>
    %209 = arith.addf %205, %208 : vector<2x32xf32>
    %210 = vector.extract_strided_slice %202 {offsets = [0, 96], sizes = [2, 32], strides = [1, 1]} : vector<2x128xf32> to vector<2x32xf32>
    %211 = math.tanh %209 : vector<2x32xf32>
    %212 = arith.mulf %210, %211 : vector<2x32xf32>
    %213 = vector.extract_strided_slice %194 {offsets = [0, 128], sizes = [2, 128], strides = [1, 1]} : vector<4x384xf32> to vector<2x128xf32>
    %214 = vector.extract_strided_slice %194 {offsets = [2, 256], sizes = [2, 128], strides = [1, 1]} : vector<4x384xf32> to vector<2x128xf32>
    %215 = arith.addf %213, %214 : vector<2x128xf32>
    %216 = vector.broadcast %11 : vector<1x128xf32> to vector<2x128xf32>
    %217 = arith.addf %215, %216 : vector<2x128xf32>
    %218 = arith.negf %217 : vector<2x128xf32>
    %219 = math.exp %218 : vector<2x128xf32>
    %cst_33 = arith.constant 1.000000e+00 : f32
    %220 = vector.broadcast %cst_33 : f32 to vector<2x128xf32>
    %221 = arith.addf %220, %219 : vector<2x128xf32>
    %222 = arith.divf %220, %221 : vector<2x128xf32>
    %223 = math.tanh %217 : vector<2x128xf32>
    %224 = vector.extract_strided_slice %222 {offsets = [0, 32], sizes = [2, 32], strides = [1, 1]} : vector<2x128xf32> to vector<2x32xf32>
    %225 = arith.mulf %224, %188 : vector<2x32xf32>
    %226 = vector.extract_strided_slice %222 {offsets = [0, 0], sizes = [2, 32], strides = [1, 1]} : vector<2x128xf32> to vector<2x32xf32>
    %227 = vector.extract_strided_slice %223 {offsets = [0, 64], sizes = [2, 32], strides = [1, 1]} : vector<2x128xf32> to vector<2x32xf32>
    %228 = arith.mulf %226, %227 : vector<2x32xf32>
    %229 = arith.addf %225, %228 : vector<2x32xf32>
    %230 = vector.extract_strided_slice %222 {offsets = [0, 96], sizes = [2, 32], strides = [1, 1]} : vector<2x128xf32> to vector<2x32xf32>
    %231 = math.tanh %229 : vector<2x32xf32>
    %232 = arith.mulf %230, %231 : vector<2x32xf32>
    %c8 = arith.constant 8 : index
    %c0_34 = arith.constant 0 : index
    %233 = vector.load %arg18[%c8, %c0_34] : memref<16x33xf32, #tpu.memory_space<vmem>>, vector<2x32xf32>
    tpu.vector_store %arg18[%c8, %c0_34], %232 {strides = array<i32>} : memref<16x33xf32, #tpu.memory_space<vmem>>, vector<2x32xf32>,
    %234 = tpu.concatenate %212, %232 in 0 : vector<2x32xf32>, vector<2x32xf32> -> vector<4x32xf32>
    %cst_35 = arith.constant dense<0.000000e+00> : vector<4x384xf32>
    %235 = tpu.matmul %234, %10, %cst_35 {dimension_numbers = #tpu.dot_dimension_numbers<[1], [0], [0], [1], [0, 0, 1, 1], [], []>} : vector<4x32xf32>, vector<32x384xf32>, vector<4x384xf32> -> vector<4x384xf32>
    %236 = vector.extract_strided_slice %8 {offsets = [12, 0], sizes = [2, 128], strides = [1, 1]} : vector<16x128xf32> to vector<2x128xf32>
    %237 = vector.extract_strided_slice %235 {offsets = [0, 0], sizes = [2, 128], strides = [1, 1]} : vector<4x384xf32> to vector<2x128xf32>
    %238 = arith.addf %236, %237 : vector<2x128xf32>
    %239 = arith.negf %238 : vector<2x128xf32>
    %240 = math.exp %239 : vector<2x128xf32>
    %cst_36 = arith.constant 1.000000e+00 : f32
    %241 = vector.broadcast %cst_36 : f32 to vector<2x128xf32>
    %242 = arith.addf %241, %240 : vector<2x128xf32>
    %243 = arith.divf %241, %242 : vector<2x128xf32>
    %244 = math.tanh %238 : vector<2x128xf32>
    %245 = vector.extract_strided_slice %243 {offsets = [0, 32], sizes = [2, 32], strides = [1, 1]} : vector<2x128xf32> to vector<2x32xf32>
    %246 = arith.mulf %245, %209 : vector<2x32xf32>
    %247 = vector.extract_strided_slice %243 {offsets = [0, 0], sizes = [2, 32], strides = [1, 1]} : vector<2x128xf32> to vector<2x32xf32>
    %248 = vector.extract_strided_slice %244 {offsets = [0, 64], sizes = [2, 32], strides = [1, 1]} : vector<2x128xf32> to vector<2x32xf32>
    %249 = arith.mulf %247, %248 : vector<2x32xf32>
    %250 = arith.addf %246, %249 : vector<2x32xf32>
    %251 = vector.extract_strided_slice %243 {offsets = [0, 96], sizes = [2, 32], strides = [1, 1]} : vector<2x128xf32> to vector<2x32xf32>
    %252 = math.tanh %250 : vector<2x32xf32>
    %253 = arith.mulf %251, %252 : vector<2x32xf32>
    %254 = vector.extract_strided_slice %235 {offsets = [0, 128], sizes = [2, 128], strides = [1, 1]} : vector<4x384xf32> to vector<2x128xf32>
    %255 = vector.extract_strided_slice %235 {offsets = [2, 256], sizes = [2, 128], strides = [1, 1]} : vector<4x384xf32> to vector<2x128xf32>
    %256 = arith.addf %254, %255 : vector<2x128xf32>
    %257 = vector.broadcast %11 : vector<1x128xf32> to vector<2x128xf32>
    %258 = arith.addf %256, %257 : vector<2x128xf32>
    %259 = arith.negf %258 : vector<2x128xf32>
    %260 = math.exp %259 : vector<2x128xf32>
    %cst_37 = arith.constant 1.000000e+00 : f32
    %261 = vector.broadcast %cst_37 : f32 to vector<2x128xf32>
    %262 = arith.addf %261, %260 : vector<2x128xf32>
    %263 = arith.divf %261, %262 : vector<2x128xf32>
    %264 = math.tanh %258 : vector<2x128xf32>
    %265 = vector.extract_strided_slice %263 {offsets = [0, 32], sizes = [2, 32], strides = [1, 1]} : vector<2x128xf32> to vector<2x32xf32>
    %266 = arith.mulf %265, %229 : vector<2x32xf32>
    %267 = vector.extract_strided_slice %263 {offsets = [0, 0], sizes = [2, 32], strides = [1, 1]} : vector<2x128xf32> to vector<2x32xf32>
    %268 = vector.extract_strided_slice %264 {offsets = [0, 64], sizes = [2, 32], strides = [1, 1]} : vector<2x128xf32> to vector<2x32xf32>
    %269 = arith.mulf %267, %268 : vector<2x32xf32>
    %270 = arith.addf %266, %269 : vector<2x32xf32>
    %271 = vector.extract_strided_slice %263 {offsets = [0, 96], sizes = [2, 32], strides = [1, 1]} : vector<2x128xf32> to vector<2x32xf32>
    %272 = math.tanh %270 : vector<2x32xf32>
    %273 = arith.mulf %271, %272 : vector<2x32xf32>
    %c10 = arith.constant 10 : index
    %c0_38 = arith.constant 0 : index
    %274 = vector.load %arg18[%c10, %c0_38] : memref<16x33xf32, #tpu.memory_space<vmem>>, vector<2x32xf32>
    tpu.vector_store %arg18[%c10, %c0_38], %273 {strides = array<i32>} : memref<16x33xf32, #tpu.memory_space<vmem>>, vector<2x32xf32>,
    %275 = tpu.concatenate %253, %273 in 0 : vector<2x32xf32>, vector<2x32xf32> -> vector<4x32xf32>
    %cst_39 = arith.constant dense<0.000000e+00> : vector<4x384xf32>
    %276 = tpu.matmul %275, %10, %cst_39 {dimension_numbers = #tpu.dot_dimension_numbers<[1], [0], [0], [1], [0, 0, 1, 1], [], []>} : vector<4x32xf32>, vector<32x384xf32>, vector<4x384xf32> -> vector<4x384xf32>
    %277 = vector.extract_strided_slice %8 {offsets = [14, 0], sizes = [2, 128], strides = [1, 1]} : vector<16x128xf32> to vector<2x128xf32>
    %278 = vector.extract_strided_slice %276 {offsets = [0, 0], sizes = [2, 128], strides = [1, 1]} : vector<4x384xf32> to vector<2x128xf32>
    %279 = arith.addf %277, %278 : vector<2x128xf32>
    %280 = arith.negf %279 : vector<2x128xf32>
    %281 = math.exp %280 : vector<2x128xf32>
    %cst_40 = arith.constant 1.000000e+00 : f32
    %282 = vector.broadcast %cst_40 : f32 to vector<2x128xf32>
    %283 = arith.addf %282, %281 : vector<2x128xf32>
    %284 = arith.divf %282, %283 : vector<2x128xf32>
    %285 = math.tanh %279 : vector<2x128xf32>
    %286 = vector.extract_strided_slice %284 {offsets = [0, 32], sizes = [2, 32], strides = [1, 1]} : vector<2x128xf32> to vector<2x32xf32>
    %287 = arith.mulf %286, %250 : vector<2x32xf32>
    %288 = vector.extract_strided_slice %284 {offsets = [0, 0], sizes = [2, 32], strides = [1, 1]} : vector<2x128xf32> to vector<2x32xf32>
    %289 = vector.extract_strided_slice %285 {offsets = [0, 64], sizes = [2, 32], strides = [1, 1]} : vector<2x128xf32> to vector<2x32xf32>
    %290 = arith.mulf %288, %289 : vector<2x32xf32>
    %291 = arith.addf %287, %290 : vector<2x32xf32>
    %292 = vector.extract_strided_slice %284 {offsets = [0, 96], sizes = [2, 32], strides = [1, 1]} : vector<2x128xf32> to vector<2x32xf32>
    %293 = math.tanh %291 : vector<2x32xf32>
    %294 = arith.mulf %292, %293 : vector<2x32xf32>
    %295 = vector.extract_strided_slice %276 {offsets = [0, 128], sizes = [2, 128], strides = [1, 1]} : vector<4x384xf32> to vector<2x128xf32>
    %296 = vector.extract_strided_slice %276 {offsets = [2, 256], sizes = [2, 128], strides = [1, 1]} : vector<4x384xf32> to vector<2x128xf32>
    %297 = arith.addf %295, %296 : vector<2x128xf32>
    %298 = vector.broadcast %11 : vector<1x128xf32> to vector<2x128xf32>
    %299 = arith.addf %297, %298 : vector<2x128xf32>
    %300 = arith.negf %299 : vector<2x128xf32>
    %301 = math.exp %300 : vector<2x128xf32>
    %cst_41 = arith.constant 1.000000e+00 : f32
    %302 = vector.broadcast %cst_41 : f32 to vector<2x128xf32>
    %303 = arith.addf %302, %301 : vector<2x128xf32>
    %304 = arith.divf %302, %303 : vector<2x128xf32>
    %305 = math.tanh %299 : vector<2x128xf32>
    %306 = vector.extract_strided_slice %304 {offsets = [0, 32], sizes = [2, 32], strides = [1, 1]} : vector<2x128xf32> to vector<2x32xf32>
    %307 = arith.mulf %306, %270 : vector<2x32xf32>
    %308 = vector.extract_strided_slice %304 {offsets = [0, 0], sizes = [2, 32], strides = [1, 1]} : vector<2x128xf32> to vector<2x32xf32>
    %309 = vector.extract_strided_slice %305 {offsets = [0, 64], sizes = [2, 32], strides = [1, 1]} : vector<2x128xf32> to vector<2x32xf32>
    %310 = arith.mulf %308, %309 : vector<2x32xf32>
    %311 = arith.addf %307, %310 : vector<2x32xf32>
    %312 = vector.extract_strided_slice %304 {offsets = [0, 96], sizes = [2, 32], strides = [1, 1]} : vector<2x128xf32> to vector<2x32xf32>
    %313 = math.tanh %311 : vector<2x32xf32>
    %314 = arith.mulf %312, %313 : vector<2x32xf32>
    %c12 = arith.constant 12 : index
    %c0_42 = arith.constant 0 : index
    %315 = vector.load %arg18[%c12, %c0_42] : memref<16x33xf32, #tpu.memory_space<vmem>>, vector<2x32xf32>
    tpu.vector_store %arg18[%c12, %c0_42], %314 {strides = array<i32>} : memref<16x33xf32, #tpu.memory_space<vmem>>, vector<2x32xf32>,
    %316 = tpu.concatenate %294, %314 in 0 : vector<2x32xf32>, vector<2x32xf32> -> vector<4x32xf32>
    %cst_43 = arith.constant dense<0.000000e+00> : vector<4x384xf32>
    %317 = tpu.matmul %316, %10, %cst_43 {dimension_numbers = #tpu.dot_dimension_numbers<[1], [0], [0], [1], [0, 0, 1, 1], [], []>} : vector<4x32xf32>, vector<32x384xf32>, vector<4x384xf32> -> vector<4x384xf32>
    %318 = vector.extract_strided_slice %317 {offsets = [0, 128], sizes = [2, 128], strides = [1, 1]} : vector<4x384xf32> to vector<2x128xf32>
    %319 = vector.extract_strided_slice %317 {offsets = [2, 256], sizes = [2, 128], strides = [1, 1]} : vector<4x384xf32> to vector<2x128xf32>
    %320 = arith.addf %318, %319 : vector<2x128xf32>
    %321 = vector.broadcast %11 : vector<1x128xf32> to vector<2x128xf32>
    %322 = arith.addf %320, %321 : vector<2x128xf32>
    %323 = arith.negf %322 : vector<2x128xf32>
    %324 = math.exp %323 : vector<2x128xf32>
    %cst_44 = arith.constant 1.000000e+00 : f32
    %325 = vector.broadcast %cst_44 : f32 to vector<2x128xf32>
    %326 = arith.addf %325, %324 : vector<2x128xf32>
    %327 = arith.divf %325, %326 : vector<2x128xf32>
    %328 = math.tanh %322 : vector<2x128xf32>
    %329 = vector.extract_strided_slice %327 {offsets = [0, 32], sizes = [2, 32], strides = [1, 1]} : vector<2x128xf32> to vector<2x32xf32>
    %330 = arith.mulf %329, %311 : vector<2x32xf32>
    %331 = vector.extract_strided_slice %327 {offsets = [0, 0], sizes = [2, 32], strides = [1, 1]} : vector<2x128xf32> to vector<2x32xf32>
    %332 = vector.extract_strided_slice %328 {offsets = [0, 64], sizes = [2, 32], strides = [1, 1]} : vector<2x128xf32> to vector<2x32xf32>
    %333 = arith.mulf %331, %332 : vector<2x32xf32>
    %334 = arith.addf %330, %333 : vector<2x32xf32>
    %335 = vector.extract_strided_slice %327 {offsets = [0, 96], sizes = [2, 32], strides = [1, 1]} : vector<2x128xf32> to vector<2x32xf32>
    %336 = math.tanh %334 : vector<2x32xf32>
    %337 = arith.mulf %335, %336 : vector<2x32xf32>
    %c14 = arith.constant 14 : index
    %c0_45 = arith.constant 0 : index
    %338 = vector.load %arg18[%c14, %c0_45] : memref<16x33xf32, #tpu.memory_space<vmem>>, vector<2x32xf32>
    tpu.vector_store %arg18[%c14, %c0_45], %337 {strides = array<i32>} : memref<16x33xf32, #tpu.memory_space<vmem>>, vector<2x32xf32>,
    %c0_46 = arith.constant 0 : index
    %c0_47 = arith.constant 0 : index
    %339 = vector.load %arg18[%c0_46, %c0_47] : memref<16x33xf32, #tpu.memory_space<vmem>>, vector<16x33xf32>
    %c0_48 = arith.constant 0 : index
    %c0_49 = arith.constant 0 : index
    %340 = vector.load %arg8[%c0_48, %c0_49] : memref<33x512xbf16, #tpu.memory_space<vmem>>, vector<33x512xbf16>
    %341 = arith.extf %340 : vector<33x512xbf16> to vector<33x512xf32>
    %cst_50 = arith.constant dense<0.000000e+00> : vector<16x512xf32>
    %342 = tpu.matmul %339, %341, %cst_50 {dimension_numbers = #tpu.dot_dimension_numbers<[1], [0], [0], [1], [0, 0, 1, 1], [], []>} : vector<16x33xf32>, vector<33x512xf32>, vector<16x512xf32> -> vector<16x512xf32>
    %c0_51 = arith.constant 0 : index
    %c0_52 = arith.constant 0 : index
    %343 = vector.load %arg9[%c0_51, %c0_52] : memref<1x512xf32, #tpu.memory_space<vmem>>, vector<1x512xf32>
    %344 = vector.broadcast %343 : vector<1x512xf32> to vector<16x512xf32>
    %345 = arith.addf %342, %344 : vector<16x512xf32>
    %cst_53 = arith.constant 0.000000e+00 : f32
    %346 = vector.broadcast %cst_53 : f32 to vector<16x512xf32>
    %347 = arith.maximumf %345, %346 : vector<16x512xf32>
    %c0_54 = arith.constant 0 : index
    %c0_55 = arith.constant 0 : index
    %348 = vector.load %arg10[%c0_54, %c0_55] : memref<512x256xbf16, #tpu.memory_space<vmem>>, vector<512x256xbf16>
    %349 = arith.extf %348 : vector<512x256xbf16> to vector<512x256xf32>
    %cst_56 = arith.constant dense<0.000000e+00> : vector<16x256xf32>
    %350 = tpu.matmul %347, %349, %cst_56 {dimension_numbers = #tpu.dot_dimension_numbers<[1], [0], [0], [1], [0, 0, 1, 1], [], []>} : vector<16x512xf32>, vector<512x256xf32>, vector<16x256xf32> -> vector<16x256xf32>
    %c0_57 = arith.constant 0 : index
    %c0_58 = arith.constant 0 : index
    %351 = vector.load %arg11[%c0_57, %c0_58] : memref<1x256xf32, #tpu.memory_space<vmem>>, vector<1x256xf32>
    %352 = vector.broadcast %351 : vector<1x256xf32> to vector<16x256xf32>
    %353 = arith.addf %350, %352 : vector<16x256xf32>
    %cst_59 = arith.constant 0.000000e+00 : f32
    %354 = vector.broadcast %cst_59 : f32 to vector<16x256xf32>
    %355 = arith.maximumf %353, %354 : vector<16x256xf32>
    %c0_60 = arith.constant 0 : index
    %c0_61 = arith.constant 0 : index
    %356 = vector.load %arg12[%c0_60, %c0_61] : memref<256x128xbf16, #tpu.memory_space<vmem>>, vector<256x128xbf16>
    %357 = arith.extf %356 : vector<256x128xbf16> to vector<256x128xf32>
    %cst_62 = arith.constant dense<0.000000e+00> : vector<16x128xf32>
    %358 = tpu.matmul %355, %357, %cst_62 {dimension_numbers = #tpu.dot_dimension_numbers<[1], [0], [0], [1], [0, 0, 1, 1], [], []>} : vector<16x256xf32>, vector<256x128xf32>, vector<16x128xf32> -> vector<16x128xf32>
    %c0_63 = arith.constant 0 : index
    %c0_64 = arith.constant 0 : index
    %359 = vector.load %arg13[%c0_63, %c0_64] : memref<1x128xf32, #tpu.memory_space<vmem>>, vector<1x128xf32>
    %360 = vector.broadcast %359 : vector<1x128xf32> to vector<16x128xf32>
    %361 = arith.addf %358, %360 : vector<16x128xf32>
    %cst_65 = arith.constant 0.000000e+00 : f32
    %362 = vector.broadcast %cst_65 : f32 to vector<16x128xf32>
    %363 = arith.maximumf %361, %362 : vector<16x128xf32>
    %c0_66 = arith.constant 0 : index
    %c0_67 = arith.constant 0 : index
    %364 = vector.load %arg14[%c0_66, %c0_67] : memref<1x128xf32, #tpu.memory_space<vmem>>, vector<1x128xf32>
    %365 = vector.broadcast %364 : vector<1x128xf32> to vector<16x128xf32>
    %366 = arith.mulf %363, %365 : vector<16x128xf32>
    %cst_68 = arith.constant dense<0.000000e+00> : vector<16xf32>
    %367 = vector.multi_reduction <add>, %366, %cst_68 [1] : vector<16x128xf32> to vector<16xf32>
    %368 = vector.shape_cast %367 : vector<16xf32> to vector<16x1xf32>
    %c0_69 = arith.constant 0 : index
    %c0_70 = arith.constant 0 : index
    %369 = vector.load %arg15[%c0_69, %c0_70] : memref<1x1xf32, #tpu.memory_space<vmem>>, vector<1x1xf32>
    %370 = vector.broadcast %369 : vector<1x1xf32> to vector<16x1xf32>
    %371 = arith.addf %368, %370 : vector<16x1xf32>
    %c0_71 = arith.constant 0 : index
    %c0_72 = arith.constant 0 : index
    %372 = vector.load %arg2[%c0_71, %c0_72] : memref<16x2xf32, #tpu.memory_space<vmem>>, vector<16x2xf32>
    %cst_73 = arith.constant dense<0xFF800000> : vector<1xf32>
    %373 = vector.multi_reduction <maximumf>, %371, %cst_73 [0] : vector<16x1xf32> to vector<1xf32>
    %374 = vector.shape_cast %373 : vector<1xf32> to vector<1x1xf32>
    %375 = vector.broadcast %374 : vector<1x1xf32> to vector<16x1xf32>
    %376 = arith.subf %371, %375 : vector<16x1xf32>
    %377 = math.exp %376 : vector<16x1xf32>
    %378 = vector.broadcast %377 : vector<16x1xf32> to vector<16x2xf32>
    %379 = arith.mulf %378, %372 : vector<16x2xf32>
    %cst_74 = arith.constant dense<0.000000e+00> : vector<2xf32>
    %380 = vector.multi_reduction <add>, %379, %cst_74 [0] : vector<16x2xf32> to vector<2xf32>
    %381 = vector.shape_cast %380 : vector<2xf32> to vector<1x2xf32>
    %382 = vector.broadcast %381 : vector<1x2xf32> to vector<16x2xf32>
    %383 = arith.mulf %372, %382 : vector<16x2xf32>
    %cst_75 = arith.constant dense<0.000000e+00> : vector<16xf32>
    %384 = vector.multi_reduction <add>, %383, %cst_75 [1] : vector<16x2xf32> to vector<16xf32>
    %385 = vector.shape_cast %384 : vector<16xf32> to vector<16x1xf32>
    %386 = tpu.reciprocal %385 {approx = true} : vector<16x1xf32> -> vector<16x1xf32>
    %387 = arith.mulf %377, %386 : vector<16x1xf32>
    %c0_76 = arith.constant 0 : index
    %c0_77 = arith.constant 0 : index
    %388 = vector.load %arg3[%c0_76, %c0_77] : memref<2x16xf32, #tpu.memory_space<vmem>>, vector<2x16xf32>
    %389 = vector.broadcast %387 : vector<16x1xf32> to vector<16x33xf32>
    %390 = arith.mulf %389, %339 : vector<16x33xf32>
    %cst_78 = arith.constant dense<0.000000e+00> : vector<2x33xf32>
    %391 = tpu.matmul %388, %390, %cst_78 {dimension_numbers = #tpu.dot_dimension_numbers<[1], [0], [0], [1], [0, 0, 1, 1], [], []>} : vector<2x16xf32>, vector<16x33xf32>, vector<2x33xf32> -> vector<2x33xf32>
    %c0_79 = arith.constant 0 : index
    %c0_80 = arith.constant 0 : index
    %392 = vector.load %arg16[%c0_79, %c0_80] : memref<2x33xf32, #tpu.memory_space<vmem>>, vector<2x33xf32>
    tpu.vector_store %arg16[%c0_79, %c0_80], %391 {strides = array<i32>} : memref<2x33xf32, #tpu.memory_space<vmem>>, vector<2x33xf32>,
    %c0_81 = arith.constant 0 : index
    %c0_82 = arith.constant 0 : index
    %393 = vector.load %arg17[%c0_81, %c0_82] : memref<16x1xf32, #tpu.memory_space<vmem>>, vector<16x1xf32>
    tpu.vector_store %arg17[%c0_81, %c0_82], %387 {strides = array<i32>} : memref<16x1xf32, #tpu.memory_space<vmem>>, vector<16x1xf32>,
    return
  }
}

</mosaic_0001>

<bundles_post_ra>
// kernel: tile.19
= control target key start
LH: loop header
LB: loop body
LE: loop exit
PB: predicated region body
PF: predicated region fallthrough
CT: control target
= control target key end

     0   :  { %s7_s6 = smov 3  ;;  %s21_s9 = smov 3  ;;  %vm4_vm0 = vcmask 15360   ;;  %vm11_vm1 = vcmask 130160   ;;  %vm18_vm2 = vcmask 113760   ;;  %vm25_vm3 = vcmask 97360   ;;  %s121_s0 = inlined_call_operand.vmem [shape: f32[8,2,2], index: 0, kind: input, shape index: {}]   ;;  %s122_s1 = inlined_call_operand.vmem [shape: f32[16,2], index: 1, kind: output, shape index: {}]  }
   0x1   :  { %v63_v0 = vld [vmem:[%s121_s0 + $0x7] ss:$8 sm:%s7_s6]   ;;  %s77_s10 = smov 14   ;;  %v65_v1 = vld [vmem:[%s121_s0 + $0x5] ss:$8 sm:%s21_s9]   ;;  %s14_s13 = smov 3 }
   0x2   :  { %9 = vrot.lane.b32.xlu0 %v63_v0, %s77_s10  ;;  %s78_s14 = smov 10   ;;  %v64_v2 = vld [vmem:[%s121_s0 + $0x6] ss:$8 sm:%s14_s13]   ;;  %s28_s17 = smov 3  ;;  %vm32_vm4 = vcmask 80960   ;;  %vm39_vm5 = vcmask 64560  }
   0x3   :  { %23 = vrot.lane.b32.xlu1 %v65_v1, %s78_s14  ;;  %v66_v3 = vld [vmem:[%s121_s0 + $0x4] ss:$8 sm:%s28_s17]   ;;  %s35_s20 = smov 3  ;;  %s42_s21 = smov 3  ;;  %vm46_vm6 = vcmask 48160   ;;  %vm53_vm7 = vcmask 31760  }
   0x4   :  { %s79_s22 = smov 12   ;;  %s80_s23 = smov 8   ;;  %v67_v4 = vld [vmem:[%s121_s0 + $0x3] ss:$8 sm:%s35_s20]   ;;  %v68_v5 = vld [vmem:[%s121_s0 + $0x2] ss:$8 sm:%s42_s21]  }
   0x5   :  { %s2_s26 = smov 3  ;;  %s49_s29 = smov 3 }
   0x6   :  { %16 = vrot.lane.b32.xlu0 %v64_v2, %s79_s22  ;;  %v3_v6 = vld [vmem:[%s121_s0] ss:$8 sm:%s2_s26]   ;;  %s81_s3 = smov 6   ;;  %s82_s4 = smov 4  }
   0x7   :  { %30 = vrot.lane.b32.xlu1 %v66_v3, %s80_s23  ;;  %5 = vst.msk [vmem:[#allocation0] sm:$0x3] %vm4_vm0, %v3_v6   ;;  %v69_v7 = vld [vmem:[%s121_s0 + $0x1] ss:$8 sm:%s49_s29]   ;;  %s83_s0 = smov 2  }
   0xa   :  { %37 = vrot.lane.b32.xlu0 %v67_v4, %s81_s3 }
   0xb   :  { %44 = vrot.lane.b32.xlu1 %v68_v5, %s82_s4 }
   0xe   :  { %51 = vrot.lane.b32.xlu0 %v69_v7, %s83_s0 }
  0x74   :  { %v10_v8 = vpop.permute.xlu0 %9  }
  0x75   :  { %12 = vst.msk [vmem:[#allocation0] sm:$0x3] %vm11_vm1, %v10_v8   ;;  %v24_v9 = vpop.permute.xlu1 %23  }
  0x78   :  { %v17_v10 = vpop.permute.xlu0 %16  }
  0x79   :  { %19 = vst.msk [vmem:[#allocation0] sm:$0x3] %vm18_vm2, %v17_v10   ;;  %v31_v11 = vpop.permute.xlu1 %30  }
  0x7a   :  { %26 = vst.msk [vmem:[#allocation0] sm:$0x3] %vm25_vm3, %v24_v9  }
  0x7b   :  { %33 = vst.msk [vmem:[#allocation0] sm:$0x3] %vm32_vm4, %v31_v11  }
  0x7c   :  { %v38_v12 = vpop.permute.xlu0 %37  }
  0x7d   :  { %40 = vst.msk [vmem:[#allocation0] sm:$0x3] %vm39_vm5, %v38_v12   ;;  %v45_v13 = vpop.permute.xlu1 %44  }
  0x7e   :  { %47 = vst.msk [vmem:[#allocation0] sm:$0x3] %vm46_vm6, %v45_v13  }
  0x80   :  { %v52_v14 = vpop.permute.xlu0 %51  }
  0x81   :  { %54 = vst.msk [vmem:[#allocation0] sm:$0x3] %vm53_vm7, %v52_v14  }
  0x88   :  { %v59_v15 = vld [vmem:[#allocation0] sm:$0x3] }
  0x89   :  { %62 = vst [vmem:[%s122_s1] sm:$0x3] %v59_v15 }

// kernel: lstm_network_forward.1
= control target key start
LH: loop header
LB: loop body
LE: loop exit
PB: predicated region body
PF: predicated region fallthrough
CT: control target
= control target key end

     0   :  { %s4203_s0 = inlined_call_operand.vmem [shape: f32[16,16], index: 0, kind: input, shape index: {}]   ;;  %s4204_s1 = inlined_call_operand.vmem [shape: f32[16,1], index: 1, kind: input, shape index: {}]   ;;  %s4205_s2 = inlined_call_operand.vmem [shape: f32[16,2], index: 2, kind: input, shape index: {}]   ;;  %s4206_s3 = inlined_call_operand.vmem [shape: f32[2,16], index: 3, kind: input, shape index: {}]   ;;  %s4207_s4 = inlined_call_operand.vmem [shape: bf16[16,128], index: 4, kind: input, shape index: {}]   ;;  %s4208_s5 = inlined_call_operand.vmem [shape: f32[1,128], index: 5, kind: input, shape index: {}]   ;;  %s4209_s6 = inlined_call_operand.vmem [shape: bf16[32,384], index: 6, kind: input, shape index: {}]   ;;  %s4210_s7 = inlined_call_operand.vmem [shape: f32[1,128], index: 7, kind: input, shape index: {}]   ;;  %s4211_s8 = inlined_call_operand.vmem [shape: bf16[33,512], index: 8, kind: input, shape index: {}]   ;;  %s4212_s9 = inlined_call_operand.vmem [shape: f32[1,512], index: 9, kind: input, shape index: {}]   ;;  %s4213_s10 = inlined_call_operand.vmem [shape: bf16[512,256], index: 10, kind: input, shape index: {}]   ;;  %s4214_s11 = inlined_call_operand.vmem [shape: f32[1,256], index: 11, kind: input, shape index: {}]   ;;  %s4215_s12 = inlined_call_operand.vmem [shape: bf16[256,128], index: 12, kind: input, shape index: {}]   ;;  %s4216_s13 = inlined_call_operand.vmem [shape: f32[1,128], index: 13, kind: input, shape index: {}]   ;;  %s4217_s14 = inlined_call_operand.vmem [shape: f32[1,128], index: 14, kind: input, shape index: {}]   ;;  %s4218_s15 = inlined_call_operand.<no memory space> [shape: f32[1,1], index: 15, kind: input, shape index: {}]   ;;  %s4219_s16 = inlined_call_operand.hbm [shape: f32[2,33], index: 16, kind: output, shape index: {0}]   ;;  %s4220_s17 = inlined_call_operand.vmem [shape: f32[16,1], index: 17, kind: output, shape index: {1}]  }
   0x1   :  { %4223 = sst [smem:[#allocation7_spill]] %s4203_s0  ;;  %v23_v0 = vstv %s4218_s15 }
   0x2   :  { %4224 = sst [smem:[#allocation8_spill]] %s4204_s1  ;;  %24 = vst [vmem:[#allocation3] sm:$0x1] %v23_v0 }
   0x3   :  { %v2890_v1 = vld [vmem:[%s4207_s4] sm:$0xff]   ;;  %s4225_s0 = sld [smem:[#allocation7_spill]]  ;;  %vm84_vm0 = vcmask 130048  }
   0x4   :  { %v2891_v3 = vunpack.c.l.bf16 %v2890_v1  ;;  %v2892_v4 = vunpack.c.h.bf16 %v2890_v1 }
   0x9   :  { %v71_v2 = vld [vmem:[%s4225_s0] sm:$0xff] }
   0xa   :  { %3061 = vmatprep.mubr.msk.f32.mxu0 %vm84_vm0, %v71_v2 }
   0xb   :  { %25 = vsyncpa [#allocation5], 0  ;;  %3057 = vmatprep.subr.mxu0 %v2892_v4  ;;  %v72_v5 = vld [vmem:[%s4225_s0 + $0x8] sm:$0xff]  ;;  %v2841_v6 = vld [vmem:[%s4208_s5] ss:$0 sm:$0xff]  ;;  %s3326_s19 = smov 64  }
   0xc   :  { %3058 = vmatpush3.msra.mxu0 %v2892_v4  ;;  %s3327_s5 = smov 32   ;;  %v172_v21 = vld [vmem:[%s4209_s6 + $0x24] sm:$0xff]  ;;  %v173_v22 = vld [vmem:[%s4209_s6 + $0x20] ss:$12 sps:$4 sm:$0xff]   ;;  %v170_v23 = vld [vmem:[%s4209_s6 + $0x18] sm:$0xff]  ;;  %v3328_v25 = vmov 0.0  }
   0xd   :  { %3059 = vmatprep.subr.mxu0 %v2891_v3  ;;  %v3459_v24 = vunpack.c.h.bf16 %v172_v21  ;;  %v3462_v26 = vunpack.c.l.bf16 %v172_v21  ;;  %v3464_v27 = vunpack.c.h.bf16 %v173_v22  ;;  %v3466_v28 = vunpack.c.h.bf16 %v170_v23  ;;  %v168_v29 = vld [vmem:[%s4209_s6 + $0xc] sm:$0xff]  ;;  %v169_v30 = vld [vmem:[%s4209_s6 + $0x8] ss:$12 sps:$4 sm:$0xff]   ;;  %283 = vmatprep.mubr.f32.mxu1 %v3328_v25  ;;  %v166_v33 = vld [vmem:[%s4209_s6] sm:$0xff]  ;;  %s4226_s4 = sld [smem:[#allocation8_spill]]  ;;  %s3331_s21 = smov [#allocation4]  }
   0xe   :  { %3060 = vmatpush3.msra.mxu0 %v2891_v3  ;;  %v3475_v31 = vunpack.c.l.bf16 %v170_v23  ;;  %v3477_v32 = vunpack.c.l.bf16 %v173_v22  ;;  %vm3329_vm1 = vmmov 0   ;;  %v3486_v34 = vunpack.c.h.bf16 %v168_v29  ;;  %v3540_v49 = vld [vmem:[%s4210_s7] ss:$0 sm:$0xff]  ;;  %s2829_s22 = sshll.u32 %s3331_s21, 4  ;;  %s2830_s22 = int_to_ptr.vmem [resolvable:$true] %s2829_s22 }
   0xf   :  { %3062 = vmatmul.mubr.msk.f32.vlgmr.msra.gmra.mxu0 %vm84_vm0, %v72_v5  ;;  %3064 = vmatprep.subr.mxu0 %v3328_v25  ;;  %v3488_v35 = vunpack.c.h.bf16 %v169_v30  ;;  %v3492_v36 = vunpack.c.l.bf16 %v168_v29  ;;  %v3496_v37 = vunpack.c.h.bf16 %v166_v33  ;;  %v3498_v38 = vunpack.c.l.bf16 %v169_v30  ;;  %p3309_p1 = scmp.lt.s32.totalorder %s2830_s22, %s2830_s22 }
  0x10   :  { %3072 = vmatprep.mubr.msk.f32.mxu0 %vm3329_vm1, %v3328_v25  ;;  %243 = vmatprep.subr.mxu1 %v3459_v24  ;;  %v3502_v39 = vunpack.c.l.bf16 %v166_v33  ;;  %vm211_vm2 = vcmask 1041408   ;;  %vm216_vm3 = vcmask 261120   ;;  %vm68_vm4 = vcmask 269568  }
  0x11   :  { %3065 = vmatpush3.msra.mxu0 %v3464_v27  ;;  %244 = vmatpush1.msra.mxu1 %v3462_v26  ;;  %vm430_vm5 = vcmask 254976   ;;  %vm1974_vm6 = vcmask 1040384   ;;  %vm1967_vm7 = vcmask 269312   ;;  %vm2683_vm8 = vcmask 7168  }
  0x12   :  { %3066 = vmatprep.subr.mxu0 %v3328_v25  ;;  %245 = vmatprep.subr.mxu1 %v3466_v28  ;;  %vm2711_vm9 = vcmask 15360   ;;  %vm2819_vm10 = vcmask 263168  }
  0x13   :  { %3067 = vmatpush3.msra.mxu0 %v3477_v32  ;;  %246 = vmatpush1.msra.mxu1 %v3475_v31 }
  0x14   :  { %3068 = vmatprep.subr.mxu0 %v3328_v25  ;;  %247 = vmatprep.subr.mxu1 %v3486_v34 }
  0x15   :  { %3069 = vmatpush3.msra.mxu0 %v3488_v35  ;;  %248 = vmatpush1.msra.mxu1 %v3492_v36 }
  0x16   :  { %3070 = vmatprep.subr.mxu0 %v3328_v25  ;;  %249 = vmatprep.subr.mxu1 %v3496_v37 }
  0x17   :  { %3071 = vmatpush3.msra.mxu0 %v3498_v38  ;;  %250 = vmatpush1.msra.mxu1 %v3502_v39 }
  0x18   :  { %467 = vmatprep.subr.mxu1 %v3459_v24  ;;  %3075 = vmatprep.subr.mxu0 %v3328_v25 }
  0xcf   :  { %v3063_v7 = vpop.f32.mrf.mxu0 }
  0xd0   :  { %v3439_v8 = vadd.f32 %v3063_v7, %v2841_v6 }
  0xd1   :  { %v157_v9 = vpop.f32.mrf.mxu0 }
  0xd2   :  { %v3441_v10 = vadd.f32 %v2841_v6, %v157_v9 }
  0xd4   :  { %3167 = vtanh.f32 %v3441_v10  ;;  %v2844_v12 = vmul.f32 -1.442695, %v3441_v10 }
  0xd6   :  { %3169 = vpow2.f32 %v2844_v12 }
  0xe1   :  { %v3168_v11 = vpop.eup %3167 }
  0xe2   :  { %196 = vrot.lane.b32.xlu0 %v3168_v11, %s3326_s19 }
  0xe3   :  { %v3170_v13 = vpop.eup %3169 }
  0xe4   :  { %v190_v14 = vadd.f32 1.0, %v3170_v13 }
  0xe6   :  { %3171 = vrcp.f32 %v190_v14 }
  0xf3   :  { %v3172_v15 = vpop.eup %3171 }
  0xf4   :  { %v194_v18 = vmul.f32 0.0, %v3172_v15 }
 0x154   :  { %v197_v16 = vpop.permute.xlu0 %196 }
 0x155   :  { %v199_v17 = vmul.f32 %v3172_v15, %v197_v16 }
 0x157   :  { %201 = vrot.lane.b32.xlu0 %v199_v17, %s3327_s5 }
 0x1c9   :  { %v202_v19 = vpop.permute.xlu0 %201 }
 0x1ca   :  { %v3447_v20 = vadd.f32 %v202_v19, %v194_v18 }
 0x1cc   :  { %3173 = vtanh.f32 %v3447_v20  ;;  %v372_v5 = vrot.slane %v3447_v20, 6 }
 0x1d9   :  { %v3174_v40 = vpop.eup %3173 }
 0x1da   :  { %207 = vrot.lane.b32.xlu1 %v3174_v40, %s3326_s19 }
 0x24c   :  { %v208_v41 = vpop.permute.xlu1 %207 }
 0x24d   :  { %v210_v42 = vmul.f32 %v3172_v15, %v208_v41 }
 0x24f   :  { %v212_v43 = vsel %vm211_vm2, %v210_v42, 0.0 }
 0x250   :  { %214 = vrot.lane.b32.xlu1 %v212_v43, %s3327_s5 }
 0x2c2   :  { %v215_v44 = vpop.permute.xlu1 %214 }
 0x2c3   :  { %2845 = vmatmul.mubr.msk.f32.vlgmr.msra.gmra.mxu1 %vm216_vm3, %v215_v44  ;;  %3073 = vmatmul.mubr.msk.f32.vlgmr.msra.gmra.mxu0 %vm216_vm3, %v215_v44 }
 0x2c4   :  { %468 = vmatpush1.msra.mxu1 %v3462_v26  ;;  %3076 = vmatpush3.msra.mxu0 %v3464_v27 }
 0x2c5   :  { %469 = vmatprep.subr.mxu1 %v3466_v28  ;;  %3077 = vmatprep.subr.mxu0 %v3328_v25 }
 0x2c6   :  { %470 = vmatpush1.msra.mxu1 %v3475_v31  ;;  %3078 = vmatpush3.msra.mxu0 %v3477_v32 }
 0x2c7   :  { %471 = vmatprep.subr.mxu1 %v3486_v34  ;;  %3079 = vmatprep.subr.mxu0 %v3328_v25 }
 0x2c8   :  { %472 = vmatpush1.msra.mxu1 %v3492_v36  ;;  %3080 = vmatpush3.msra.mxu0 %v3488_v35 }
 0x2c9   :  { %473 = vmatprep.subr.mxu1 %v3496_v37  ;;  %3081 = vmatprep.subr.mxu0 %v3328_v25 }
 0x2ca   :  { %474 = vmatpush1.msra.mxu1 %v3502_v39  ;;  %507 = vmatprep.mubr.f32.mxu1 %v3328_v25 }
 0x2cb   :  { %3082 = vmatpush3.msra.mxu0 %v3498_v38  ;;  %3083 = vmatprep.mubr.msk.f32.mxu0 %vm3329_vm1, %v3328_v25 }
 0x2cc   :  { %684 = vmatprep.subr.mxu1 %v3459_v24  ;;  %3086 = vmatprep.subr.mxu0 %v3328_v25 }
 0x383   :  { %v285_v45 = vpop.f32.mrf.mxu1  ;;  %v356_v46 = vpop.f32.mrf.mxu0 }
 0x384   :  { %v361_v47 = vrot.slane %v285_v45, 6  ;;  %v392_v48 = vrot.slane %v356_v46, 2 }
 0x385   :  { %v287_v50 = vpop.f32.mrf.mxu1  ;;  %v3074_v51 = vpop.f32.mrf.mxu0 }
 0x386   :  { %v363_v52 = vadd.f32 %v361_v47, %v3441_v10  ;;  %v394_v53 = vadd.f32 %v392_v48, %v287_v50 }
 0x388   :  { %3175 = vtanh.f32 %v363_v52  ;;  %v401_v54 = vadd.f32 %v3540_v49, %v394_v53  ;;  %v2847_v57 = vmul.f32 -1.442695, %v363_v52 }
 0x38a   :  { %3177 = vtanh.f32 %v401_v54  ;;  %v2849_v58 = vmul.f32 -1.442695, %v401_v54 }
 0x38b   :  { %3179 = vpow2.f32 %v2847_v57 }
 0x38c   :  { %3181 = vpow2.f32 %v2849_v58 }
 0x395   :  { %v3176_v55 = vpop.eup %3175 }
 0x396   :  { %376 = vrot.lane.b32.xlu0 %v3176_v55, %s3326_s19 }
 0x397   :  { %v3178_v56 = vpop.eup %3177 }
 0x398   :  { %411 = vrot.lane.b32.xlu1 %v3178_v56, %s3326_s19  ;;  %v3180_v59 = vpop.eup %3179 }
 0x399   :  { %v3182_v60 = vpop.eup %3181  ;;  %v367_v61 = vadd.f32 1.0, %v3180_v59 }
 0x39a   :  { %v405_v62 = vadd.f32 1.0, %v3182_v60 }
 0x39b   :  { %3183 = vrcp.f32 %v367_v61 }
 0x39c   :  { %3185 = vrcp.f32 %v405_v62 }
 0x3a8   :  { %v3184_v63 = vpop.eup %3183 }
 0x3a9   :  { %v3186_v2 = vpop.eup %3185  ;;  %v374_v6 = vmul.f32 %v3184_v63, %v372_v5 }
 0x3aa   :  { %v409_v11 = vmul.f32 0.0, %v3186_v2 }
 0x408   :  { %v377_v0 = vpop.permute.xlu0 %376 }
 0x409   :  { %v379_v1 = vmul.f32 %v3184_v63, %v377_v0 }
 0x40a   :  { %v412_v3 = vpop.permute.xlu1 %411 }
 0x40b   :  { %381 = vrot.lane.b32.xlu0 %v379_v1, %s3327_s5  ;;  %v414_v4 = vmul.f32 %v3186_v2, %v412_v3 }
 0x40d   :  { %416 = vrot.lane.b32.xlu1 %v414_v4, %s3327_s5 }
 0x47d   :  { %v382_v7 = vpop.permute.xlu0 %381 }
 0x47e   :  { %v3549_v9 = vadd.f32 %v382_v7, %v374_v6 }
 0x47f   :  { %v417_v12 = vpop.permute.xlu1 %416 }
 0x480   :  { %3187 = vtanh.f32 %v3549_v9  ;;  %v3552_v13 = vadd.f32 %v417_v12, %v409_v11  ;;  %v596_v61 = vrot.slane %v3549_v9, 6 }
 0x482   :  { %3189 = vtanh.f32 %v3552_v13 }
 0x48d   :  { %v3188_v14 = vpop.eup %3187 }
 0x48e   :  { %387 = vrot.lane.b32.xlu0 %v3188_v14, %s3326_s19 }
 0x48f   :  { %v3190_v15 = vpop.eup %3189 }
 0x490   :  { %422 = vrot.lane.b32.xlu1 %v3190_v15, %s3326_s19 }
 0x500   :  { %v388_v16 = vpop.permute.xlu0 %387 }
 0x501   :  { %v390_v17 = vmul.f32 %v3184_v63, %v388_v16 }
 0x502   :  { %v423_v18 = vpop.permute.xlu1 %422 }
 0x503   :  { %v3557_v19 = vmul.f32 %v3186_v2, %v423_v18  ;;  %v433_v20 = vrot.slane %v390_v17, 2 }
 0x505   :  { %v435_v21 = vrot.slane %v3557_v19, 6 }
 0x507   :  { %v437_v22 = vsel %vm211_vm2, %v433_v20, %v435_v21 }
 0x508   :  { %439 = vrot.lane.b32.xlu0 %v437_v22, %s3327_s5 }
 0x57a   :  { %v440_v23 = vpop.permute.xlu0 %439 }
 0x57b   :  { %2850 = vmatmul.mubr.msk.f32.vlgmr.msra.gmra.mxu1 %vm216_vm3, %v440_v23  ;;  %3084 = vmatmul.mubr.msk.f32.vlgmr.msra.gmra.mxu0 %vm216_vm3, %v440_v23 }
 0x57c   :  { %685 = vmatpush1.msra.mxu1 %v3462_v26  ;;  %3087 = vmatpush3.msra.mxu0 %v3464_v27 }
 0x57d   :  { %686 = vmatprep.subr.mxu1 %v3466_v28  ;;  %3088 = vmatprep.subr.mxu0 %v3328_v25 }
 0x57e   :  { %687 = vmatpush1.msra.mxu1 %v3475_v31  ;;  %3089 = vmatpush3.msra.mxu0 %v3477_v32 }
 0x57f   :  { %688 = vmatprep.subr.mxu1 %v3486_v34  ;;  %3090 = vmatprep.subr.mxu0 %v3328_v25 }
 0x580   :  { %689 = vmatpush1.msra.mxu1 %v3492_v36  ;;  %3091 = vmatpush3.msra.mxu0 %v3488_v35 }
 0x581   :  { %690 = vmatprep.subr.mxu1 %v3496_v37  ;;  %3092 = vmatprep.subr.mxu0 %v3328_v25 }
 0x582   :  { %691 = vmatpush1.msra.mxu1 %v3502_v39  ;;  %724 = vmatprep.mubr.f32.mxu1 %v3328_v25 }
 0x583   :  { %3093 = vmatpush3.msra.mxu0 %v3498_v38  ;;  %3094 = vmatprep.mubr.msk.f32.mxu0 %vm3329_vm1, %v3328_v25 }
 0x584   :  { %901 = vmatprep.subr.mxu1 %v3459_v24  ;;  %3097 = vmatprep.subr.mxu0 %v3328_v25 }
 0x63b   :  { %v509_v29 = vpop.f32.mrf.mxu1  ;;  %v580_v30 = vpop.f32.mrf.mxu0 }
 0x63c   :  { %v585_v33 = vrot.slane %v509_v29, 4  ;;  %v616_v40 = vrot.slane %v580_v30, 2 }
 0x63d   :  { %v511_v41 = vpop.f32.mrf.mxu1  ;;  %v3085_v42 = vpop.f32.mrf.mxu0 }
 0x63e   :  { %v587_v43 = vadd.f32 %v585_v33, %v3441_v10  ;;  %v618_v44 = vadd.f32 %v616_v40, %v511_v41 }
 0x640   :  { %3191 = vtanh.f32 %v587_v43  ;;  %v619_v45 = vadd.f32 %v3540_v49, %v618_v44  ;;  %v2852_v48 = vmul.f32 -1.442695, %v587_v43 }
 0x642   :  { %3193 = vtanh.f32 %v619_v45  ;;  %v2853_v50 = vmul.f32 -1.442695, %v619_v45 }
 0x643   :  { %3195 = vpow2.f32 %v2852_v48 }
 0x644   :  { %3197 = vpow2.f32 %v2853_v50 }
 0x64d   :  { %v3192_v46 = vpop.eup %3191 }
 0x64e   :  { %600 = vrot.lane.b32.xlu1 %v3192_v46, %s3326_s19 }
 0x64f   :  { %v3194_v47 = vpop.eup %3193 }
 0x650   :  { %629 = vrot.lane.b32.xlu0 %v3194_v47, %s3326_s19  ;;  %v3196_v51 = vpop.eup %3195 }
 0x651   :  { %v3198_v52 = vpop.eup %3197  ;;  %v591_v53 = vadd.f32 1.0, %v3196_v51 }
 0x652   :  { %v623_v54 = vadd.f32 1.0, %v3198_v52 }
 0x653   :  { %3199 = vrcp.f32 %v591_v53 }
 0x654   :  { %3201 = vrcp.f32 %v623_v54 }
 0x660   :  { %v3200_v55 = vpop.eup %3199 }
 0x661   :  { %v3202_v58 = vpop.eup %3201  ;;  %v598_v62 = vmul.f32 %v3200_v55, %v596_v61 }
 0x662   :  { %v627_v1 = vmul.f32 %v3202_v58, %v3552_v13 }
 0x6c0   :  { %v601_v56 = vpop.permute.xlu1 %600 }
 0x6c1   :  { %v603_v57 = vmul.f32 %v3200_v55, %v601_v56 }
 0x6c2   :  { %v630_v59 = vpop.permute.xlu0 %629 }
 0x6c3   :  { %605 = vrot.lane.b32.xlu1 %v603_v57, %s3327_s5  ;;  %v632_v60 = vmul.f32 %v3202_v58, %v630_v59 }
 0x6c5   :  { %634 = vrot.lane.b32.xlu0 %v632_v60, %s3327_s5 }
 0x735   :  { %v606_v63 = vpop.permute.xlu1 %605 }
 0x736   :  { %v3590_v0 = vadd.f32 %v606_v63, %v598_v62 }
 0x737   :  { %v635_v2 = vpop.permute.xlu0 %634 }
 0x738   :  { %3203 = vtanh.f32 %v3590_v0  ;;  %v3594_v3 = vadd.f32 %v635_v2, %v627_v1  ;;  %v813_v53 = vrot.slane %v3590_v0, 6 }
 0x73a   :  { %3205 = vtanh.f32 %v3594_v3 }
 0x745   :  { %v3204_v4 = vpop.eup %3203 }
 0x746   :  { %611 = vrot.lane.b32.xlu1 %v3204_v4, %s3326_s19 }
 0x747   :  { %v3206_v5 = vpop.eup %3205 }
 0x748   :  { %640 = vrot.lane.b32.xlu0 %v3206_v5, %s3326_s19 }
 0x7b8   :  { %v612_v6 = vpop.permute.xlu1 %611 }
 0x7b9   :  { %v614_v7 = vmul.f32 %v3200_v55, %v612_v6 }
 0x7ba   :  { %v641_v9 = vpop.permute.xlu0 %640 }
 0x7bb   :  { %v3599_v11 = vmul.f32 %v3202_v58, %v641_v9  ;;  %v650_v12 = vrot.slane %v614_v7, 4 }
 0x7bd   :  { %v652_v13 = vrot.slane %v3599_v11, 6 }
 0x7bf   :  { %v654_v14 = vsel %vm211_vm2, %v650_v12, %v652_v13 }
 0x7c0   :  { %656 = vrot.lane.b32.xlu1 %v654_v14, %s3327_s5 }
 0x832   :  { %v657_v15 = vpop.permute.xlu1 %656 }
 0x833   :  { %2854 = vmatmul.mubr.msk.f32.vlgmr.msra.gmra.mxu1 %vm216_vm3, %v657_v15  ;;  %3095 = vmatmul.mubr.msk.f32.vlgmr.msra.gmra.mxu0 %vm216_vm3, %v657_v15 }
 0x834   :  { %902 = vmatpush1.msra.mxu1 %v3462_v26  ;;  %3098 = vmatpush3.msra.mxu0 %v3464_v27 }
 0x835   :  { %903 = vmatprep.subr.mxu1 %v3466_v28  ;;  %3099 = vmatprep.subr.mxu0 %v3328_v25 }
 0x836   :  { %904 = vmatpush1.msra.mxu1 %v3475_v31  ;;  %3100 = vmatpush3.msra.mxu0 %v3477_v32 }
 0x837   :  { %905 = vmatprep.subr.mxu1 %v3486_v34  ;;  %3101 = vmatprep.subr.mxu0 %v3328_v25 }
 0x838   :  { %906 = vmatpush1.msra.mxu1 %v3492_v36  ;;  %3102 = vmatpush3.msra.mxu0 %v3488_v35 }
 0x839   :  { %907 = vmatprep.subr.mxu1 %v3496_v37  ;;  %3103 = vmatprep.subr.mxu0 %v3328_v25 }
 0x83a   :  { %908 = vmatpush1.msra.mxu1 %v3502_v39  ;;  %941 = vmatprep.mubr.f32.mxu1 %v3328_v25 }
 0x83b   :  { %3104 = vmatpush3.msra.mxu0 %v3498_v38  ;;  %3105 = vmatprep.mubr.msk.f32.mxu0 %vm3329_vm1, %v3328_v25 }
 0x83c   :  { %1112 = vmatprep.subr.mxu1 %v3459_v24  ;;  %3108 = vmatprep.subr.mxu0 %v3328_v25 }
 0x8f3   :  { %v726_v16 = vpop.f32.mrf.mxu1  ;;  %v797_v17 = vpop.f32.mrf.mxu0 }
 0x8f4   :  { %v802_v18 = vrot.slane %v726_v16, 2  ;;  %v833_v20 = vrot.slane %v797_v17, 2 }
 0x8f5   :  { %v728_v21 = vpop.f32.mrf.mxu1  ;;  %v3096_v22 = vpop.f32.mrf.mxu0 }
 0x8f6   :  { %v804_v23 = vadd.f32 %v802_v18, %v3441_v10  ;;  %v835_v29 = vadd.f32 %v833_v20, %v728_v21 }
 0x8f8   :  { %3207 = vtanh.f32 %v804_v23  ;;  %v836_v30 = vadd.f32 %v3540_v49, %v835_v29  ;;  %v2856_v41 = vmul.f32 -1.442695, %v804_v23 }
 0x8fa   :  { %3209 = vtanh.f32 %v836_v30  ;;  %v2857_v42 = vmul.f32 -1.442695, %v836_v30 }
 0x8fb   :  { %3211 = vpow2.f32 %v2856_v41 }
 0x8fc   :  { %3213 = vpow2.f32 %v2857_v42 }
 0x905   :  { %v3208_v33 = vpop.eup %3207 }
 0x906   :  { %817 = vrot.lane.b32.xlu0 %v3208_v33, %s3326_s19 }
 0x907   :  { %v3210_v40 = vpop.eup %3209 }
 0x908   :  { %846 = vrot.lane.b32.xlu1 %v3210_v40, %s3326_s19  ;;  %v3212_v43 = vpop.eup %3211 }
 0x909   :  { %v3214_v44 = vpop.eup %3213  ;;  %v808_v45 = vadd.f32 1.0, %v3212_v43 }
 0x90a   :  { %v840_v46 = vadd.f32 1.0, %v3214_v44 }
 0x90b   :  { %3215 = vrcp.f32 %v808_v45 }
 0x90c   :  { %3217 = vrcp.f32 %v840_v46 }
 0x918   :  { %v3216_v10 = vpop.eup %3215 }
 0x919   :  { %v3218_v50 = vpop.eup %3217  ;;  %v815_v54 = vmul.f32 %v3216_v10, %v813_v53 }
 0x91a   :  { %v844_v57 = vmul.f32 %v3218_v50, %v3594_v3 }
 0x978   :  { %v818_v47 = vpop.permute.xlu0 %817 }
 0x979   :  { %v820_v48 = vmul.f32 %v3216_v10, %v818_v47 }
 0x97a   :  { %v847_v51 = vpop.permute.xlu1 %846 }
 0x97b   :  { %822 = vrot.lane.b32.xlu0 %v820_v48, %s3327_s5  ;;  %v849_v52 = vmul.f32 %v3218_v50, %v847_v51 }
 0x97d   :  { %851 = vrot.lane.b32.xlu1 %v849_v52, %s3327_s5 }
 0x9ed   :  { %v823_v55 = vpop.permute.xlu0 %822 }
 0x9ee   :  { %v3632_v56 = vadd.f32 %v823_v55, %v815_v54 }
 0x9ef   :  { %v852_v58 = vpop.permute.xlu1 %851 }
 0x9f0   :  { %3219 = vtanh.f32 %v3632_v56  ;;  %v3636_v59 = vadd.f32 %v852_v58, %v844_v57  ;;  %v1027_v45 = vrot.slane %v3632_v56, 6 }
 0x9f2   :  { %3221 = vtanh.f32 %v3636_v59 }
 0x9fd   :  { %v3220_v60 = vpop.eup %3219 }
 0x9fe   :  { %828 = vrot.lane.b32.xlu0 %v3220_v60, %s3326_s19 }
 0x9ff   :  { %v3222_v61 = vpop.eup %3221 }
 0xa00   :  { %857 = vrot.lane.b32.xlu1 %v3222_v61, %s3326_s19 }
 0xa70   :  { %v829_v62 = vpop.permute.xlu0 %828 }
 0xa71   :  { %v831_v63 = vmul.f32 %v3216_v10, %v829_v62 }
 0xa72   :  { %v858_v0 = vpop.permute.xlu1 %857 }
 0xa73   :  { %v3641_v1 = vmul.f32 %v3218_v50, %v858_v0  ;;  %v867_v2 = vrot.slane %v831_v63, 6 }
 0xa75   :  { %v869_v3 = vrot.slane %v3641_v1, 6 }
 0xa77   :  { %v871_v4 = vsel %vm211_vm2, %v867_v2, %v869_v3 }
 0xa78   :  { %873 = vrot.lane.b32.xlu0 %v871_v4, %s3327_s5 }
 0xaea   :  { %v874_v5 = vpop.permute.xlu0 %873 }
 0xaeb   :  { %2858 = vmatmul.mubr.msk.f32.vlgmr.msra.gmra.mxu1 %vm216_vm3, %v874_v5  ;;  %3106 = vmatmul.mubr.msk.f32.vlgmr.msra.gmra.mxu0 %vm216_vm3, %v874_v5 }
 0xaec   :  { %1113 = vmatpush1.msra.mxu1 %v3462_v26  ;;  %3109 = vmatpush3.msra.mxu0 %v3464_v27 }
 0xaed   :  { %1114 = vmatprep.subr.mxu1 %v3466_v28  ;;  %3110 = vmatprep.subr.mxu0 %v3328_v25 }
 0xaee   :  { %1115 = vmatpush1.msra.mxu1 %v3475_v31  ;;  %3111 = vmatpush3.msra.mxu0 %v3477_v32 }
 0xaef   :  { %1116 = vmatprep.subr.mxu1 %v3486_v34  ;;  %3112 = vmatprep.subr.mxu0 %v3328_v25 }
 0xaf0   :  { %1117 = vmatpush1.msra.mxu1 %v3492_v36  ;;  %3113 = vmatpush3.msra.mxu0 %v3488_v35 }
 0xaf1   :  { %1118 = vmatprep.subr.mxu1 %v3496_v37  ;;  %3114 = vmatprep.subr.mxu0 %v3328_v25 }
 0xaf2   :  { %1119 = vmatpush1.msra.mxu1 %v3502_v39  ;;  %1152 = vmatprep.mubr.f32.mxu1 %v3328_v25 }
 0xaf3   :  { %3115 = vmatpush3.msra.mxu0 %v3498_v38  ;;  %3116 = vmatprep.mubr.msk.f32.mxu0 %vm3329_vm1, %v3328_v25 }
 0xaf4   :  { %1329 = vmatprep.subr.mxu1 %v3459_v24  ;;  %3119 = vmatprep.subr.mxu0 %v3328_v25 }
 0xbab   :  { %v943_v6 = vpop.f32.mrf.mxu1  ;;  %v1014_v7 = vpop.f32.mrf.mxu0 }
 0xbac   :  { %v1018_v9 = vadd.f32 %v943_v6, %v3439_v8  ;;  %v1047_v12 = vrot.slane %v1014_v7, 2 }
 0xbad   :  { %v945_v13 = vpop.f32.mrf.mxu1  ;;  %v3107_v14 = vpop.f32.mrf.mxu0 }
 0xbae   :  { %3223 = vtanh.f32 %v1018_v9  ;;  %v1049_v15 = vadd.f32 %v1047_v12, %v945_v13  ;;  %v2860_v20 = vmul.f32 -1.442695, %v1018_v9 }
 0xbb0   :  { %v1050_v16 = vadd.f32 %v3540_v49, %v1049_v15 }
 0xbb2   :  { %3225 = vtanh.f32 %v1050_v16  ;;  %v2861_v21 = vmul.f32 -1.442695, %v1050_v16 }
 0xbb3   :  { %3227 = vpow2.f32 %v2860_v20 }
 0xbb4   :  { %3229 = vpow2.f32 %v2861_v21 }
 0xbbb   :  { %v3224_v17 = vpop.eup %3223 }
 0xbbc   :  { %1031 = vrot.lane.b32.xlu0 %v3224_v17, %s3326_s19 }
 0xbbf   :  { %v3226_v18 = vpop.eup %3225 }
 0xbc0   :  { %1060 = vrot.lane.b32.xlu1 %v3226_v18, %s3326_s19  ;;  %v3228_v22 = vpop.eup %3227 }
 0xbc1   :  { %v1022_v23 = vadd.f32 1.0, %v3228_v22  ;;  %v3230_v29 = vpop.eup %3229 }
 0xbc2   :  { %v1054_v30 = vadd.f32 1.0, %v3230_v29 }
 0xbc3   :  { %3231 = vrcp.f32 %v1022_v23 }
 0xbc4   :  { %3233 = vrcp.f32 %v1054_v30 }
 0xbd0   :  { %v3232_v33 = vpop.eup %3231 }
 0xbd1   :  { %v3234_v42 = vpop.eup %3233  ;;  %v1029_v46 = vmul.f32 %v3232_v33, %v1027_v45 }
 0xbd2   :  { %v1058_v48 = vmul.f32 %v3234_v42, %v3636_v59 }
 0xc2e   :  { %v1032_v40 = vpop.permute.xlu0 %1031 }
 0xc2f   :  { %v1034_v41 = vmul.f32 %v3232_v33, %v1032_v40 }
 0xc31   :  { %1036 = vrot.lane.b32.xlu0 %v1034_v41, %s3327_s5 }
 0xc32   :  { %v1061_v43 = vpop.permute.xlu1 %1060 }
 0xc33   :  { %v1063_v44 = vmul.f32 %v3234_v42, %v1061_v43 }
 0xc35   :  { %1065 = vrot.lane.b32.xlu1 %v1063_v44, %s3327_s5 }
 0xca3   :  { %v1037_v10 = vpop.permute.xlu0 %1036 }
 0xca4   :  { %v3674_v47 = vadd.f32 %v1037_v10, %v1029_v46 }
 0xca6   :  { %3235 = vtanh.f32 %v3674_v47  ;;  %v1241_v30 = vrot.slane %v3674_v47, 6 }
 0xca7   :  { %v1066_v50 = vpop.permute.xlu1 %1065 }
 0xca8   :  { %v3678_v51 = vadd.f32 %v1066_v50, %v1058_v48 }
 0xcaa   :  { %3237 = vtanh.f32 %v3678_v51 }
 0xcb3   :  { %v3236_v52 = vpop.eup %3235 }
 0xcb4   :  { %1042 = vrot.lane.b32.xlu0 %v3236_v52, %s3326_s19 }
 0xcb7   :  { %v3238_v53 = vpop.eup %3237 }
 0xcb8   :  { %1071 = vrot.lane.b32.xlu1 %v3238_v53, %s3326_s19 }
 0xd26   :  { %v1043_v54 = vpop.permute.xlu0 %1042 }
 0xd27   :  { %v1045_v57 = vmul.f32 %v3232_v33, %v1043_v54 }
 0xd2a   :  { %v1072_v55 = vpop.permute.xlu1 %1071 }
 0xd2b   :  { %v3683_v56 = vmul.f32 %v3234_v42, %v1072_v55 }
 0xd2d   :  { %v1080_v58 = vrot.slane %v3683_v56, 6 }
 0xd2f   :  { %v1082_v59 = vsel %vm211_vm2, %v1045_v57, %v1080_v58 }
 0xd30   :  { %1084 = vrot.lane.b32.xlu1 %v1082_v59, %s3327_s5 }
 0xda2   :  { %v1085_v60 = vpop.permute.xlu1 %1084 }
 0xda3   :  { %2862 = vmatmul.mubr.msk.f32.vlgmr.msra.gmra.mxu1 %vm216_vm3, %v1085_v60  ;;  %3117 = vmatmul.mubr.msk.f32.vlgmr.msra.gmra.mxu0 %vm216_vm3, %v1085_v60 }
 0xda4   :  { %1330 = vmatpush1.msra.mxu1 %v3462_v26  ;;  %3120 = vmatpush3.msra.mxu0 %v3464_v27 }
 0xda5   :  { %1331 = vmatprep.subr.mxu1 %v3466_v28  ;;  %3121 = vmatprep.subr.mxu0 %v3328_v25 }
 0xda6   :  { %1332 = vmatpush1.msra.mxu1 %v3475_v31  ;;  %3122 = vmatpush3.msra.mxu0 %v3477_v32 }
 0xda7   :  { %1333 = vmatprep.subr.mxu1 %v3486_v34  ;;  %3123 = vmatprep.subr.mxu0 %v3328_v25 }
 0xda8   :  { %1334 = vmatpush1.msra.mxu1 %v3492_v36  ;;  %3124 = vmatpush3.msra.mxu0 %v3488_v35 }
 0xda9   :  { %1335 = vmatprep.subr.mxu1 %v3496_v37  ;;  %3125 = vmatprep.subr.mxu0 %v3328_v25 }
 0xdaa   :  { %1336 = vmatpush1.msra.mxu1 %v3502_v39  ;;  %1369 = vmatprep.mubr.f32.mxu1 %v3328_v25 }
 0xdab   :  { %3126 = vmatpush3.msra.mxu0 %v3498_v38  ;;  %3127 = vmatprep.mubr.msk.f32.mxu0 %vm3329_vm1, %v3328_v25 }
 0xdac   :  { %1546 = vmatprep.subr.mxu1 %v3459_v24  ;;  %3130 = vmatprep.subr.mxu0 %v3328_v25 }
 0xe63   :  { %v1154_v61 = vpop.f32.mrf.mxu1  ;;  %v1225_v62 = vpop.f32.mrf.mxu0 }
 0xe64   :  { %v1230_v63 = vrot.slane %v1154_v61, 6  ;;  %v1261_v0 = vrot.slane %v1225_v62, 2 }
 0xe65   :  { %v1156_v2 = vpop.f32.mrf.mxu1  ;;  %v3118_v3 = vpop.f32.mrf.mxu0 }
 0xe66   :  { %v1232_v4 = vadd.f32 %v1230_v63, %v3439_v8  ;;  %v1263_v5 = vadd.f32 %v1261_v0, %v1156_v2 }
 0xe68   :  { %3239 = vtanh.f32 %v1232_v4  ;;  %v1264_v6 = vadd.f32 %v3540_v49, %v1263_v5  ;;  %v2864_v12 = vmul.f32 -1.442695, %v1232_v4 }
 0xe6a   :  { %3241 = vtanh.f32 %v1264_v6  ;;  %v2865_v13 = vmul.f32 -1.442695, %v1264_v6 }
 0xe6b   :  { %3243 = vpow2.f32 %v2864_v12 }
 0xe6c   :  { %3245 = vpow2.f32 %v2865_v13 }
 0xe75   :  { %v3240_v7 = vpop.eup %3239 }
 0xe76   :  { %1245 = vrot.lane.b32.xlu0 %v3240_v7, %s3326_s19 }
 0xe77   :  { %v3242_v9 = vpop.eup %3241 }
 0xe78   :  { %1274 = vrot.lane.b32.xlu1 %v3242_v9, %s3326_s19  ;;  %v3244_v14 = vpop.eup %3243 }
 0xe79   :  { %v3246_v15 = vpop.eup %3245  ;;  %v1236_v16 = vadd.f32 1.0, %v3244_v14 }
 0xe7a   :  { %v1268_v17 = vadd.f32 1.0, %v3246_v15 }
 0xe7b   :  { %3247 = vrcp.f32 %v1236_v16 }
 0xe7c   :  { %3249 = vrcp.f32 %v1268_v17 }
 0xe88   :  { %v3248_v18 = vpop.eup %3247 }
 0xe89   :  { %v3250_v22 = vpop.eup %3249  ;;  %v1243_v33 = vmul.f32 %v3248_v18, %v1241_v30 }
 0xe8a   :  { %v1272_v42 = vmul.f32 %v3250_v22, %v3678_v51 }
 0xee8   :  { %v1246_v20 = vpop.permute.xlu0 %1245 }
 0xee9   :  { %v1248_v21 = vmul.f32 %v3248_v18, %v1246_v20 }
 0xeea   :  { %v1275_v23 = vpop.permute.xlu1 %1274 }
 0xeeb   :  { %1250 = vrot.lane.b32.xlu0 %v1248_v21, %s3327_s5  ;;  %v1277_v29 = vmul.f32 %v3250_v22, %v1275_v23 }
 0xeed   :  { %1279 = vrot.lane.b32.xlu1 %v1277_v29, %s3327_s5 }
 0xf5d   :  { %v1251_v40 = vpop.permute.xlu0 %1250 }
 0xf5e   :  { %v3716_v41 = vadd.f32 %v1251_v40, %v1243_v33 }
 0xf5f   :  { %v1280_v43 = vpop.permute.xlu1 %1279 }
 0xf60   :  { %3251 = vtanh.f32 %v3716_v41  ;;  %v3720_v44 = vadd.f32 %v1280_v43, %v1272_v42 }
 0xf62   :  { %3253 = vtanh.f32 %v3720_v44 }
 0xf6d   :  { %v3252_v45 = vpop.eup %3251 }
 0xf6e   :  { %1256 = vrot.lane.b32.xlu0 %v3252_v45, %s3326_s19 }
 0xf6f   :  { %v3254_v46 = vpop.eup %3253 }
 0xf70   :  { %1285 = vrot.lane.b32.xlu1 %v3254_v46, %s3326_s19 }
 0xfe0   :  { %v1257_v10 = vpop.permute.xlu0 %1256 }
 0xfe1   :  { %v1259_v47 = vmul.f32 %v3248_v18, %v1257_v10  ;;  %v1458_v18 = vrot.slane %v3716_v41, 6 }
 0xfe2   :  { %v1286_v48 = vpop.permute.xlu1 %1285 }
 0xfe3   :  { %v3725_v50 = vmul.f32 %v3250_v22, %v1286_v48  ;;  %v1295_v52 = vrot.slane %v1259_v47, 2 }
 0xfe5   :  { %v1297_v51 = vrot.slane %v3725_v50, 6 }
 0xfe7   :  { %v1299_v53 = vsel %vm211_vm2, %v1295_v52, %v1297_v51 }
 0xfe8   :  { %1301 = vrot.lane.b32.xlu0 %v1299_v53, %s3327_s5 }
0x105a   :  { %v1302_v54 = vpop.permute.xlu0 %1301 }
0x105b   :  { %2866 = vmatmul.mubr.msk.f32.vlgmr.msra.gmra.mxu1 %vm216_vm3, %v1302_v54  ;;  %3128 = vmatmul.mubr.msk.f32.vlgmr.msra.gmra.mxu0 %vm216_vm3, %v1302_v54 }
0x105c   :  { %1547 = vmatpush1.msra.mxu1 %v3462_v26  ;;  %3131 = vmatpush3.msra.mxu0 %v3464_v27 }
0x105d   :  { %1548 = vmatprep.subr.mxu1 %v3466_v28  ;;  %3132 = vmatprep.subr.mxu0 %v3328_v25 }
0x105e   :  { %1549 = vmatpush1.msra.mxu1 %v3475_v31  ;;  %3133 = vmatpush3.msra.mxu0 %v3477_v32 }
0x105f   :  { %1550 = vmatprep.subr.mxu1 %v3486_v34  ;;  %3134 = vmatprep.subr.mxu0 %v3328_v25 }
0x1060   :  { %1551 = vmatpush1.msra.mxu1 %v3492_v36  ;;  %3135 = vmatpush3.msra.mxu0 %v3488_v35 }
0x1061   :  { %1552 = vmatprep.subr.mxu1 %v3496_v37  ;;  %3136 = vmatprep.subr.mxu0 %v3328_v25 }
0x1062   :  { %1553 = vmatpush1.msra.mxu1 %v3502_v39  ;;  %1586 = vmatprep.mubr.f32.mxu1 %v3328_v25 }
0x1063   :  { %3137 = vmatpush3.msra.mxu0 %v3498_v38  ;;  %3138 = vmatprep.mubr.msk.f32.mxu0 %vm3329_vm1, %v3328_v25 }
0x1064   :  { %1763 = vmatprep.subr.mxu1 %v3459_v24  ;;  %3141 = vmatprep.subr.mxu0 %v3328_v25 }
0x111b   :  { %v1371_v55 = vpop.f32.mrf.mxu1  ;;  %v1442_v57 = vpop.f32.mrf.mxu0 }
0x111c   :  { %v1447_v58 = vrot.slane %v1371_v55, 4  ;;  %v1478_v59 = vrot.slane %v1442_v57, 2 }
0x111d   :  { %v1373_v60 = vpop.f32.mrf.mxu1  ;;  %v3129_v61 = vpop.f32.mrf.mxu0 }
0x111e   :  { %v1449_v62 = vadd.f32 %v1447_v58, %v3439_v8  ;;  %v1480_v63 = vadd.f32 %v1478_v59, %v1373_v60 }
0x1120   :  { %3255 = vtanh.f32 %v1449_v62  ;;  %v1481_v0 = vadd.f32 %v3540_v49, %v1480_v63  ;;  %v2868_v24 = vmul.f32 -1.442695, %v1449_v62 }
0x1122   :  { %3257 = vtanh.f32 %v1481_v0  ;;  %v2869_v4 = vmul.f32 -1.442695, %v1481_v0 }
0x1123   :  { %3259 = vpow2.f32 %v2868_v24 }
0x1124   :  { %3261 = vpow2.f32 %v2869_v4 }
0x112d   :  { %v3256_v2 = vpop.eup %3255 }
0x112e   :  { %1462 = vrot.lane.b32.xlu1 %v3256_v2, %s3326_s19 }
0x112f   :  { %v3258_v3 = vpop.eup %3257 }
0x1130   :  { %1491 = vrot.lane.b32.xlu0 %v3258_v3, %s3326_s19  ;;  %v3260_v5 = vpop.eup %3259 }
0x1131   :  { %v3262_v6 = vpop.eup %3261  ;;  %v1453_v7 = vadd.f32 1.0, %v3260_v5 }
0x1132   :  { %v1485_v9 = vadd.f32 1.0, %v3262_v6 }
0x1133   :  { %3263 = vrcp.f32 %v1453_v7 }
0x1134   :  { %3265 = vrcp.f32 %v1485_v9 }
0x1140   :  { %v3264_v12 = vpop.eup %3263 }
0x1141   :  { %v3266_v15 = vpop.eup %3265  ;;  %v1460_v20 = vmul.f32 %v3264_v12, %v1458_v18 }
0x1142   :  { %v1489_v23 = vmul.f32 %v3266_v15, %v3720_v44 }
0x11a0   :  { %v1463_v13 = vpop.permute.xlu1 %1462 }
0x11a1   :  { %v1465_v14 = vmul.f32 %v3264_v12, %v1463_v13 }
0x11a2   :  { %v1492_v16 = vpop.permute.xlu0 %1491 }
0x11a3   :  { %1467 = vrot.lane.b32.xlu1 %v1465_v14, %s3327_s5  ;;  %v1494_v17 = vmul.f32 %v3266_v15, %v1492_v16 }
0x11a5   :  { %1496 = vrot.lane.b32.xlu0 %v1494_v17, %s3327_s5 }
0x1215   :  { %v1468_v21 = vpop.permute.xlu1 %1467 }
0x1216   :  { %v3758_v22 = vadd.f32 %v1468_v21, %v1460_v20 }
0x1217   :  { %v1497_v29 = vpop.permute.xlu0 %1496 }
0x1218   :  { %3267 = vtanh.f32 %v3758_v22  ;;  %v3762_v30 = vadd.f32 %v1497_v29, %v1489_v23  ;;  %v1675_v62 = vrot.slane %v3758_v22, 6 }
0x121a   :  { %3269 = vtanh.f32 %v3762_v30 }
0x1225   :  { %v3268_v33 = vpop.eup %3267 }
0x1226   :  { %1473 = vrot.lane.b32.xlu1 %v3268_v33, %s3326_s19 }
0x1227   :  { %v3270_v40 = vpop.eup %3269 }
0x1228   :  { %1502 = vrot.lane.b32.xlu0 %v3270_v40, %s3326_s19 }
0x1298   :  { %v1474_v41 = vpop.permute.xlu1 %1473 }
0x1299   :  { %v1476_v42 = vmul.f32 %v3264_v12, %v1474_v41 }
0x129a   :  { %v1503_v43 = vpop.permute.xlu0 %1502 }
0x129b   :  { %v3767_v45 = vmul.f32 %v3266_v15, %v1503_v43  ;;  %v1512_v46 = vrot.slane %v1476_v42, 4 }
0x129d   :  { %v1514_v44 = vrot.slane %v3767_v45, 6 }
0x129f   :  { %v1516_v10 = vsel %vm211_vm2, %v1512_v46, %v1514_v44 }
0x12a0   :  { %1518 = vrot.lane.b32.xlu1 %v1516_v10, %s3327_s5  ;;  %v58_v10 = vld [vmem:[%s4226_s4] sm:$0xff] }
0x1312   :  { %v1519_v47 = vpop.permute.xlu1 %1518 }
0x1313   :  { %2870 = vmatmul.mubr.msk.f32.vlgmr.msra.gmra.mxu1 %vm216_vm3, %v1519_v47  ;;  %3139 = vmatmul.mubr.msk.f32.vlgmr.msra.gmra.mxu0 %vm216_vm3, %v1519_v47 }
0x1314   :  { %1764 = vmatpush1.msra.mxu1 %v3462_v26  ;;  %3142 = vmatpush3.msra.mxu0 %v3464_v27 }
0x1315   :  { %1765 = vmatprep.subr.mxu1 %v3466_v28  ;;  %3143 = vmatprep.subr.mxu0 %v3328_v25 }
0x1316   :  { %1766 = vmatpush1.msra.mxu1 %v3475_v31  ;;  %3144 = vmatpush3.msra.mxu0 %v3477_v32 }
0x1317   :  { %1767 = vmatprep.subr.mxu1 %v3486_v34  ;;  %3145 = vmatprep.subr.mxu0 %v3328_v25 }
0x1318   :  { %1768 = vmatpush1.msra.mxu1 %v3492_v36  ;;  %3146 = vmatpush3.msra.mxu0 %v3488_v35 }
0x1319   :  { %1769 = vmatprep.subr.mxu1 %v3496_v37  ;;  %3147 = vmatprep.subr.mxu0 %v3328_v25 }
0x131a   :  { %1770 = vmatpush1.msra.mxu1 %v3502_v39  ;;  %1803 = vmatprep.mubr.f32.mxu1 %v3328_v25 }
0x131b   :  { %3148 = vmatpush3.msra.mxu0 %v3498_v38  ;;  %3149 = vmatprep.mubr.msk.f32.mxu0 %vm3329_vm1, %v3328_v25 }
0x13d3   :  { %v1588_v26 = vpop.f32.mrf.mxu1  ;;  %v1659_v27 = vpop.f32.mrf.mxu0 }
0x13d4   :  { %v1664_v28 = vrot.slane %v1588_v26, 2  ;;  %v1695_v31 = vrot.slane %v1659_v27, 2 }
0x13d5   :  { %v1590_v32 = vpop.f32.mrf.mxu1  ;;  %v3140_v34 = vpop.f32.mrf.mxu0 }
0x13d6   :  { %v1666_v35 = vadd.f32 %v1664_v28, %v3439_v8  ;;  %v1697_v36 = vadd.f32 %v1695_v31, %v1590_v32 }
0x13d8   :  { %3271 = vtanh.f32 %v1666_v35  ;;  %v1698_v37 = vadd.f32 %v3540_v49, %v1697_v36  ;;  %v2872_v48 = vmul.f32 -1.442695, %v1666_v35  ;;  %v1919_v35 = vld [vmem:[%s4211_s8 + $0x20] sm:$0xff] }
0x13da   :  { %3273 = vtanh.f32 %v1698_v37  ;;  %v2873_v52 = vmul.f32 -1.442695, %v1698_v37  ;;  %v1933_v37 = vunpack.c.l.bf16 %v1919_v35 }
0x13db   :  { %3275 = vpow2.f32 %v2872_v48 }
0x13dc   :  { %3277 = vpow2.f32 %v2873_v52 }
0x13e5   :  { %v3272_v39 = vpop.eup %3271 }
0x13e6   :  { %1679 = vrot.lane.b32.xlu0 %v3272_v39, %s3326_s19  ;;  %v1934_v39 = vunpack.c.h.bf16 %v1919_v35 }
0x13e7   :  { %v3274_v38 = vpop.eup %3273 }
0x13e8   :  { %1708 = vrot.lane.b32.xlu1 %v3274_v38, %s3326_s19  ;;  %v3276_v51 = vpop.eup %3275  ;;  %v1917_v38 = vld [vmem:[%s4211_s8 + $0x10] sm:$0xff] }
0x13e9   :  { %v3278_v53 = vpop.eup %3277  ;;  %v1670_v54 = vadd.f32 1.0, %v3276_v51  ;;  %v1930_v48 = vunpack.c.h.bf16 %v1917_v38  ;;  %v1929_v52 = vunpack.c.l.bf16 %v1917_v38  ;;  %v1915_v51 = vld [vmem:[%s4211_s8] sm:$0xff] }
0x13ea   :  { %v1702_v55 = vadd.f32 1.0, %v3278_v53  ;;  %v2153_v38 = vld [vmem:[%s4213_s10 + $0x20] sm:$0xff] }
0x13eb   :  { %3279 = vrcp.f32 %v1670_v54  ;;  %v1926_v54 = vunpack.c.h.bf16 %v1915_v51 }
0x13ec   :  { %3281 = vrcp.f32 %v1702_v55  ;;  %v1925_v55 = vunpack.c.l.bf16 %v1915_v51  ;;  %v2152_v51 = vld [vmem:[%s4213_s10 + $0x18] sm:$0xff] }
0x13f8   :  { %v3280_v8 = vpop.eup %3279 }
0x13f9   :  { %v3282_v59 = vpop.eup %3281  ;;  %v1677_v63 = vmul.f32 %v3280_v8, %v1675_v62 }
0x13fa   :  { %v1706_v3 = vmul.f32 %v3282_v59, %v3762_v30 }
0x1458   :  { %v1680_v57 = vpop.permute.xlu0 %1679 }
0x1459   :  { %v1682_v58 = vmul.f32 %v3280_v8, %v1680_v57  ;;  %v1924_v57 = vld [vmem:[%s4211_s8 + $0x48] sm:$0x11] }
0x145a   :  { %v1709_v60 = vpop.permute.xlu1 %1708 }
0x145b   :  { %1684 = vrot.lane.b32.xlu0 %v1682_v58, %s3327_s5  ;;  %v1711_v61 = vmul.f32 %v3282_v59, %v1709_v60  ;;  %v1944_v58 = vunpack.c.h.bf16 %v1924_v57  ;;  %v2164_v60 = vld [vmem:[%s4213_s10 + $0x78] sm:$0xff] }
0x145d   :  { %1713 = vrot.lane.b32.xlu1 %v1711_v61, %s3327_s5  ;;  %v2162_v61 = vld [vmem:[%s4213_s10 + $0x68] sm:$0xff] }
0x14cd   :  { %v1685_v0 = vpop.permute.xlu0 %1684 }
0x14ce   :  { %v1687_v2 = vadd.f32 %v1685_v0, %v1677_v63  ;;  %v2243_v63 = vunpack.c.l.bf16 %v2164_v60  ;;  %v2244_v0 = vunpack.c.h.bf16 %v2164_v60 }
0x14cf   :  { %v1714_v24 = vpop.permute.xlu1 %1713 }
0x14d0   :  { %3283 = vtanh.f32 %v1687_v2  ;;  %v1716_v4 = vadd.f32 %v1714_v24, %v1706_v3  ;;  %2353 = vmatprep.subr.mxu1 %v2244_v0  ;;  %v2179_v0 = vld [vmem:[%s4213_s10 + $0xf0] sm:$0xff] }
0x14d2   :  { %3285 = vtanh.f32 %v1716_v4 }
0x14dd   :  { %v3284_v5 = vpop.eup %3283 }
0x14de   :  { %1690 = vrot.lane.b32.xlu0 %v3284_v5, %s3326_s19  ;;  %v2240_v5 = vunpack.c.h.bf16 %v2162_v61 }
0x14df   :  { %v3286_v6 = vpop.eup %3285 }
0x14e0   :  { %1719 = vrot.lane.b32.xlu1 %v3286_v6, %s3326_s19  ;;  %v2239_v6 = vunpack.c.l.bf16 %v2162_v61  ;;  %v2180_v61 = vld [vmem:[%s4213_s10 + $0xf8] sm:$0xff] }
0x1550   :  { %v1691_v7 = vpop.permute.xlu0 %1690 }
0x1551   :  { %v1693_v9 = vmul.f32 %v3280_v8, %v1691_v7  ;;  %v59_v8 = vld [vmem:[%s4226_s4 + $0x8] sm:$0xff]  ;;  %v2160_v7 = vld [vmem:[%s4213_s10 + $0x58] sm:$0xff] }
0x1552   :  { %v1720_v12 = vpop.permute.xlu1 %1719 }
0x1553   :  { %v1722_v13 = vmul.f32 %v3282_v59, %v1720_v12  ;;  %v1729_v14 = vrot.slane %v1693_v9, 6 }
0x1555   :  { %v1731_v15 = vrot.slane %v1722_v13, 6 }
0x1557   :  { %v1733_v16 = vsel %vm211_vm2, %v1729_v14, %v1731_v15 }
0x1558   :  { %1735 = vrot.lane.b32.xlu0 %v1733_v16, %s3327_s5  ;;  %v2236_v16 = vunpack.c.h.bf16 %v2160_v7 }
0x15ca   :  { %v1736_v17 = vpop.permute.xlu0 %1735 }
0x15cb   :  { %2874 = vmatmul.mubr.msk.f32.vlgmr.msra.gmra.mxu1 %vm216_vm3, %v1736_v17  ;;  %3150 = vmatmul.mubr.msk.f32.vlgmr.msra.gmra.mxu0 %vm216_vm3, %v1736_v17  ;;  %v2159_v17 = vld [vmem:[%s4213_s10 + $0x50] sm:$0xff] }
0x15cc   :  { %2051 = vmatprep.mubr.f32.mxu0 %v3328_v25  ;;  %2354 = vmatpush1.msra.mxu1 %v2243_v63 }
0x168b   :  { %v1805_v18 = vpop.f32.mrf.mxu1  ;;  %v1875_v20 = vpop.f32.mrf.mxu0 }
0x168c   :  { %v1880_v21 = vrot.slane %v1875_v20, 2  ;;  %v1943_v18 = vunpack.c.l.bf16 %v1924_v57  ;;  %v1920_v20 = vld [vmem:[%s4211_s8 + $0x28] sm:$0xff]  ;;  %v2219_v57 = vunpack.c.l.bf16 %v2152_v51 }
0x168d   :  { %v1806_v22 = vpop.f32.mrf.mxu1  ;;  %v3151_v23 = vpop.f32.mrf.mxu0 }
0x168e   :  { %v1882_v29 = vadd.f32 %v1880_v21, %v1806_v22  ;;  %v2235_v22 = vunpack.c.l.bf16 %v2160_v7  ;;  %v2158_v23 = vld [vmem:[%s4213_s10 + $0x48] sm:$0xff] }
0x1690   :  { %v1883_v30 = vadd.f32 %v3540_v49, %v1882_v29 }
0x1692   :  { %3287 = vtanh.f32 %v1883_v30  ;;  %v2876_v40 = vmul.f32 -1.442695, %v1883_v30 }
0x1694   :  { %3289 = vpow2.f32 %v2876_v40  ;;  %v1918_v40 = vld [vmem:[%s4211_s8 + $0x18] sm:$0xff] }
0x169f   :  { %v3288_v33 = vpop.eup %3287 }
0x16a0   :  { %1893 = vrot.lane.b32.xlu1 %v3288_v33, %s3326_s19 }
0x16a1   :  { %v3290_v41 = vpop.eup %3289 }
0x16a2   :  { %v1887_v42 = vadd.f32 1.0, %v3290_v41  ;;  %v2234_v41 = vunpack.c.h.bf16 %v2159_v17 }
0x16a4   :  { %3291 = vrcp.f32 %v1887_v42  ;;  %v1936_v42 = vunpack.c.h.bf16 %v1920_v20 }
0x16b1   :  { %v3292_v43 = vpop.eup %3291 }
0x16b2   :  { %v1891_v49 = vmul.f32 %v3292_v43, %v1716_v4  ;;  %v2161_v4 = vld [vmem:[%s4213_s10 + $0x60] sm:$0xff] }
0x16b3   :  { %v2238_v9 = vunpack.c.h.bf16 %v2161_v4  ;;  %v2237_v14 = vunpack.c.l.bf16 %v2161_v4  ;;  %v2274_v4 = vunpack.c.h.bf16 %v2179_v0 }
0x1712   :  { %v1894_v46 = vpop.permute.xlu1 %1893 }
0x1713   :  { %v1896_v44 = vmul.f32 %v3292_v43, %v1894_v46  ;;  %v2157_v46 = vld [vmem:[%s4213_s10 + $0x40] sm:$0xff] }
0x1715   :  { %1898 = vrot.lane.b32.xlu0 %v1896_v44, %s3327_s5  ;;  %v1935_v44 = vunpack.c.l.bf16 %v1920_v20 }
0x1719   :  { %62 = vrot.lane.b32.xlu0 %v58_v10, %s3327_s5  ;;  %v1916_v10 = vld [vmem:[%s4211_s8 + $0x8] sm:$0xff] }
0x171d   :  { %645 = vrot.lane.b32.xlu0 %v3599_v11, %s3327_s5  ;;  %v1923_v11 = vld [vmem:[%s4211_s8 + $0x40] sm:$0x11] }
0x171e   :  { %v1942_v31 = vunpack.c.h.bf16 %v1923_v11 }
0x1720   :  { %2877 = vmatprep.subr.msk.mxu0 %vm1974_vm6, %v1942_v31  ;;  %v2229_v31 = vunpack.c.l.bf16 %v2157_v46 }
0x1721   :  { %1076 = vrot.lane.b32.xlu0 %v3683_v56, %s3327_s5  ;;  %v1941_v56 = vunpack.c.l.bf16 %v1923_v11  ;;  %v1931_v11 = vunpack.c.l.bf16 %v1918_v40 }
0x1723   :  { %2878 = vmatpush1.msk.msra.mxu0 %vm1974_vm6, %v1941_v56  ;;  %v1928_v56 = vunpack.c.h.bf16 %v1916_v10 }
0x1725   :  { %1290 = vrot.lane.b32.xlu0 %v3725_v50, %s3327_s5  ;;  %v1921_v50 = vld [vmem:[%s4211_s8 + $0x30] sm:$0xff] }
0x1726   :  { %v1938_v32 = vunpack.c.h.bf16 %v1921_v50  ;;  %v1937_v34 = vunpack.c.l.bf16 %v1921_v50  ;;  %v2155_v50 = vld [vmem:[%s4213_s10 + $0x30] sm:$0xff] }
0x1728   :  { %2011 = vmatprep.subr.mxu0 %v1938_v32  ;;  %v1927_v32 = vunpack.c.l.bf16 %v1916_v10 }
0x1729   :  { %1724 = vrot.lane.b32.xlu0 %v1722_v13, %s3327_s5  ;;  %2012 = vmatpush1.msra.mxu0 %v1937_v34  ;;  %v1922_v13 = vld [vmem:[%s4211_s8 + $0x38] sm:$0xff] }
0x172a   :  { %2013 = vmatprep.subr.mxu0 %v1934_v39  ;;  %v1940_v21 = vunpack.c.h.bf16 %v1922_v13  ;;  %v1939_v33 = vunpack.c.l.bf16 %v1922_v13  ;;  %v2225_v39 = vunpack.c.l.bf16 %v2155_v50 }
0x172b   :  { %2014 = vmatpush1.msra.mxu0 %v1933_v37  ;;  %v2226_v37 = vunpack.c.h.bf16 %v2155_v50 }
0x172c   :  { %2015 = vmatprep.subr.mxu0 %v1930_v48 }
0x172d   :  { %2016 = vmatpush1.msra.mxu0 %v1929_v52 }
0x172e   :  { %2017 = vmatprep.subr.mxu0 %v1926_v54  ;;  %v2221_v54 = vunpack.c.l.bf16 %v2153_v38 }
0x172f   :  { %2018 = vmatpush1.msra.mxu0 %v1925_v55  ;;  %v2151_v55 = vld [vmem:[%s4213_s10 + $0x10] sm:$0xff] }
0x1730   :  { %2881 = vmatprep.subr.msk.mxu0 %vm1974_vm6, %v1944_v58  ;;  %v2150_v58 = vld [vmem:[%s4213_s10 + $0x8] sm:$0xff] }
0x1731   :  { %v2216_v60 = vunpack.c.h.bf16 %v2150_v58 }
0x1787   :  { %v1899_v47 = vpop.permute.xlu0 %1898 }
0x1788   :  { %v1901_v26 = vadd.f32 %v1899_v47, %v1891_v49  ;;  %v2232_v49 = vunpack.c.h.bf16 %v2158_v23  ;;  %v1932_v47 = vunpack.c.h.bf16 %v1918_v40 }
0x178a   :  { %3293 = vtanh.f32 %v1901_v26  ;;  %v2231_v26 = vunpack.c.l.bf16 %v2158_v23 }
0x178b   :  { %v63_v27 = vpop.permute.xlu0 %62 }
0x178c   :  { %69 = vst.msk [vmem:[#allocation2] sm:$0xff] %vm68_vm4, %v63_v27  ;;  %v2156_v27 = vld [vmem:[%s4213_s10 + $0x38] sm:$0xff] }
0x178d   :  { %v2228_v34 = vunpack.c.h.bf16 %v2156_v27  ;;  %v2227_v35 = vunpack.c.l.bf16 %v2156_v27 }
0x178f   :  { %v646_v28 = vpop.permute.xlu0 %645 }
0x1790   :  { %648 = vst.msk [vmem:[#allocation2 + $0x2] sm:$0x3] %vm430_vm5, %v646_v28  ;;  %v2230_v28 = vunpack.c.h.bf16 %v2157_v46 }
0x1793   :  { %v1077_v36 = vpop.permute.xlu0 %1076 }
0x1794   :  { %1079 = vst.msk [vmem:[#allocation2 + $0x6] sm:$0x3] %vm430_vm5, %v1077_v36  ;;  %v2154_v36 = vld [vmem:[%s4213_s10 + $0x28] sm:$0xff] }
0x1795   :  { %v2224_v48 = vunpack.c.h.bf16 %v2154_v36  ;;  %v2223_v52 = vunpack.c.l.bf16 %v2154_v36  ;;  %v2166_v36 = vld [vmem:[%s4213_s10 + $0x88] sm:$0xff] }
0x1797   :  { %v3294_v53 = vpop.eup %3293  ;;  %v1291_v62 = vpop.permute.xlu0 %1290 }
0x1798   :  { %1904 = vrot.lane.b32.xlu1 %v3294_v53, %s3326_s19  ;;  %v2222_v53 = vunpack.c.h.bf16 %v2153_v38  ;;  %v2165_v38 = vld [vmem:[%s4213_s10 + $0x80] sm:$0xff] }
0x179b   :  { %v1725_v15 = vpop.permute.xlu0 %1724 }
0x179c   :  { %427 = vrot.lane.b32.xlu1 %v3557_v19, %s3327_s5 }
0x17a0   :  { %862 = vrot.lane.b32.xlu1 %v3641_v1, %s3327_s5 }
0x17a4   :  { %64 = vrot.lane.b32.xlu1 %v59_v8, %s3327_s5  ;;  %v2220_v8 = vunpack.c.h.bf16 %v2152_v51  ;;  %v2196_v51 = vld [vmem:[%s4213_s10 + $0x178] sm:$0xff] }
0x17a8   :  { %1507 = vrot.lane.b32.xlu1 %v3767_v45, %s3327_s5  ;;  %v2163_v45 = vld [vmem:[%s4213_s10 + $0x70] sm:$0xff] }
0x17a9   :  { %v2242_v2 = vunpack.c.h.bf16 %v2163_v45  ;;  %v2241_v24 = vunpack.c.l.bf16 %v2163_v45  ;;  %v2215_v45 = vunpack.c.l.bf16 %v2150_v58  ;;  %v2194_v58 = vld [vmem:[%s4213_s10 + $0x168] sm:$0xff] }
0x17ab   :  { %2355 = vmatprep.subr.mxu1 %v2242_v2  ;;  %v2276_v2 = vunpack.c.h.bf16 %v2180_v61 }
0x17ac   :  { %2356 = vmatpush1.msra.mxu1 %v2241_v24  ;;  %v2178_v24 = vld [vmem:[%s4213_s10 + $0xe8] sm:$0xff] }
0x17ad   :  { %2357 = vmatprep.subr.mxu1 %v2240_v5  ;;  %v2273_v5 = vunpack.c.l.bf16 %v2179_v0  ;;  %v2272_v7 = vunpack.c.h.bf16 %v2178_v24  ;;  %v2191_v0 = vld [vmem:[%s4213_s10 + $0x150] sm:$0xff] }
0x17ae   :  { %2358 = vmatpush1.msra.mxu1 %v2239_v6  ;;  %v2177_v6 = vld [vmem:[%s4213_s10 + $0xe0] sm:$0xff] }
0x17af   :  { %2359 = vmatprep.subr.mxu1 %v2238_v9  ;;  %v2271_v9 = vunpack.c.l.bf16 %v2178_v24  ;;  %v2270_v13 = vunpack.c.h.bf16 %v2177_v6  ;;  %v2298_v24 = vunpack.c.h.bf16 %v2191_v0 }
0x17b0   :  { %2360 = vmatpush1.msra.mxu1 %v2237_v14  ;;  %v2269_v14 = vunpack.c.l.bf16 %v2177_v6 }
0x17b1   :  { %2361 = vmatprep.subr.mxu1 %v2236_v16 }
0x17b2   :  { %2362 = vmatpush1.msra.mxu1 %v2235_v22  ;;  %v2173_v22 = vld [vmem:[%s4213_s10 + $0xc0] sm:$0xff] }
0x17b3   :  { %2363 = vmatprep.subr.mxu1 %v2234_v41  ;;  %v2262_v40 = vunpack.c.h.bf16 %v2173_v22  ;;  %v2261_v41 = vunpack.c.l.bf16 %v2173_v22 }
0x180a   :  { %v1905_v19 = vpop.permute.xlu1 %1904 }
0x180b   :  { %v1907_v59 = vmul.f32 %v3292_v43, %v1905_v19  ;;  %v2233_v43 = vunpack.c.l.bf16 %v2159_v17  ;;  %v2218_v19 = vunpack.c.h.bf16 %v2151_v55 }
0x180d   :  { %1909 = vrot.lane.b32.xlu1 %v1907_v59, %s3327_s5  ;;  %2364 = vmatpush1.msra.mxu1 %v2233_v43  ;;  %v2217_v59 = vunpack.c.l.bf16 %v2151_v55 }
0x180e   :  { %v428_v1 = vpop.permute.xlu1 %427  ;;  %2365 = vmatprep.subr.mxu1 %v2232_v49 }
0x180f   :  { %431 = vst.msk [vmem:[#allocation2] sm:$0x3] %vm430_vm5, %v428_v1  ;;  %2366 = vmatpush1.msra.mxu1 %v2231_v26  ;;  %v2149_v1 = vld [vmem:[%s4213_s10] sm:$0xff] }
0x1810   :  { %2367 = vmatprep.subr.mxu1 %v2230_v28  ;;  %v2213_v63 = vunpack.c.l.bf16 %v2149_v1 }
0x1811   :  { %2368 = vmatpush1.msra.mxu1 %v2229_v31 }
0x1812   :  { %v863_v3 = vpop.permute.xlu1 %862  ;;  %2369 = vmatprep.subr.mxu1 %v2228_v34 }
0x1813   :  { %865 = vst.msk [vmem:[#allocation2 + $0x4] sm:$0x3] %vm430_vm5, %v863_v3  ;;  %2370 = vmatpush1.msra.mxu1 %v2227_v35  ;;  %v2275_v3 = vunpack.c.l.bf16 %v2180_v61  ;;  %v2192_v61 = vld [vmem:[%s4213_s10 + $0x158] sm:$0xff] }
0x1814   :  { %2371 = vmatprep.subr.mxu1 %v2226_v37  ;;  %v2248_v37 = vunpack.c.h.bf16 %v2166_v36 }
0x1815   :  { %2372 = vmatpush1.msra.mxu1 %v2225_v39  ;;  %v2247_v39 = vunpack.c.l.bf16 %v2166_v36  ;;  %v2209_v36 = vld [vmem:[%s4213_s10 + $0x1e0] sm:$0xff] }
0x1816   :  { %v65_v12 = vpop.permute.xlu1 %64  ;;  %2373 = vmatprep.subr.mxu1 %v2224_v48  ;;  %v2246_v48 = vunpack.c.h.bf16 %v2165_v38 }
0x1817   :  { %70 = vst.msk [vmem:[#allocation2 + $0x8] sm:$0xff] %vm68_vm4, %v65_v12  ;;  %2374 = vmatpush1.msra.mxu1 %v2223_v52  ;;  %v2176_v12 = vld [vmem:[%s4213_s10 + $0xd8] sm:$0xff]  ;;  %v2245_v52 = vunpack.c.l.bf16 %v2165_v38 }
0x1818   :  { %1293 = vst.msk [vmem:[#allocation2 + $0x8] sm:$0x3] %vm430_vm5, %v1291_v62  ;;  %1727 = vst.msk [vmem:[#allocation2 + $0xc] sm:$0x3] %vm430_vm5, %v1725_v15  ;;  %2375 = vmatprep.subr.mxu1 %v2222_v53  ;;  %v2214_v62 = vunpack.c.h.bf16 %v2149_v1  ;;  %v2175_v15 = vld [vmem:[%s4213_s10 + $0xd0] sm:$0xff]  ;;  %v2268_v16 = vunpack.c.h.bf16 %v2176_v12  ;;  %v2267_v17 = vunpack.c.l.bf16 %v2176_v12  ;;  %v2308_v53 = vunpack.c.h.bf16 %v2196_v51  ;;  %v2193_v1 = vld [vmem:[%s4213_s10 + $0x160] sm:$0xff] }
0x1819   :  { %2376 = vmatpush1.msra.mxu1 %v2221_v54  ;;  %v2266_v20 = vunpack.c.h.bf16 %v2175_v15  ;;  %v2208_v38 = vld [vmem:[%s4213_s10 + $0x1d8] sm:$0xff] }
0x181a   :  { %v1508_v29 = vpop.permute.xlu1 %1507  ;;  %v3888_v30 = vld [vmem:[#allocation2] sm:$0xff]  ;;  %2377 = vmatprep.subr.mxu1 %v2220_v8  ;;  %v2195_v8 = vld [vmem:[%s4213_s10 + $0x170] sm:$0xff] }
0x181b   :  { %1510 = vst.msk [vmem:[#allocation2 + $0xa] sm:$0x3] %vm430_vm5, %v1508_v29  ;;  %2879 = vmatmul.mubr.msk.f32.vlgmr.msra.gmra.mxu0 %vm1967_vm7, %v3888_v30  ;;  %2378 = vmatpush1.msra.mxu1 %v2219_v57  ;;  %v2307_v57 = vunpack.c.l.bf16 %v2196_v51  ;;  %v2207_v51 = vld [vmem:[%s4213_s10 + $0x1d0] sm:$0xff] }
0x181c   :  { %2882 = vmatpush1.msk.msra.mxu0 %vm1974_vm6, %v1943_v18  ;;  %2057 = vmatprep.mubr.f32.mxu0 %v3328_v25  ;;  %v2174_v18 = vld [vmem:[%s4213_s10 + $0xc8] sm:$0xff] }
0x181d   :  { %2088 = vmatprep.subr.mxu0 %v1940_v21  ;;  %2379 = vmatprep.subr.mxu1 %v2218_v19  ;;  %v2265_v21 = vunpack.c.l.bf16 %v2175_v15  ;;  %v2264_v23 = vunpack.c.h.bf16 %v2174_v18  ;;  %v2263_v29 = vunpack.c.l.bf16 %v2174_v18  ;;  %v2306_v19 = vunpack.c.h.bf16 %v2195_v8 }
0x181e   :  { %2089 = vmatpush1.msra.mxu0 %v1939_v33  ;;  %2380 = vmatpush1.msra.mxu1 %v2217_v59  ;;  %v2172_v33 = vld [vmem:[%s4213_s10 + $0xb8] sm:$0xff]  ;;  %v2305_v59 = vunpack.c.l.bf16 %v2195_v8  ;;  %v2206_v8 = vld [vmem:[%s4213_s10 + $0x1c8] sm:$0xff] }
0x181f   :  { %2090 = vmatprep.subr.mxu0 %v1936_v42  ;;  %2381 = vmatprep.subr.mxu1 %v2216_v60  ;;  %v2171_v42 = vld [vmem:[%s4213_s10 + $0xb0] sm:$0xff]  ;;  %v2260_v43 = vunpack.c.h.bf16 %v2172_v33  ;;  %v2259_v46 = vunpack.c.l.bf16 %v2172_v33  ;;  %v2304_v60 = vunpack.c.h.bf16 %v2194_v58 }
0x1820   :  { %2091 = vmatpush1.msra.mxu0 %v1935_v44  ;;  %2382 = vmatpush1.msra.mxu1 %v2215_v45  ;;  %v2170_v44 = vld [vmem:[%s4213_s10 + $0xa8] sm:$0xff]  ;;  %v2258_v10 = vunpack.c.h.bf16 %v2171_v42  ;;  %v2257_v49 = vunpack.c.l.bf16 %v2171_v42  ;;  %v2303_v45 = vunpack.c.l.bf16 %v2194_v58  ;;  %v2329_v58 = vunpack.c.l.bf16 %v2207_v51 }
0x1821   :  { %2092 = vmatprep.subr.mxu0 %v1932_v47  ;;  %2383 = vmatprep.subr.mxu1 %v2214_v62  ;;  %v2169_v47 = vld [vmem:[%s4213_s10 + $0xa0] sm:$0xff]  ;;  %v2256_v26 = vunpack.c.h.bf16 %v2170_v44  ;;  %v2255_v27 = vunpack.c.l.bf16 %v2170_v44  ;;  %v2302_v62 = vunpack.c.h.bf16 %v2193_v1 }
0x1822   :  { %2093 = vmatpush1.msra.mxu0 %v1931_v11  ;;  %2384 = vmatpush1.msra.mxu1 %v2213_v63  ;;  %v2254_v11 = vunpack.c.h.bf16 %v2169_v47  ;;  %v2253_v28 = vunpack.c.l.bf16 %v2169_v47  ;;  %v2301_v63 = vunpack.c.l.bf16 %v2193_v1  ;;  %v2327_v1 = vunpack.c.l.bf16 %v2206_v8 }
0x1823   :  { %2094 = vmatprep.subr.mxu0 %v1928_v56  ;;  %2385 = vmatprep.subr.mxu1 %v2276_v2  ;;  %v2168_v56 = vld [vmem:[%s4213_s10 + $0x98] sm:$0xff]  ;;  %v2299_v2 = vunpack.c.l.bf16 %v2192_v61 }
0x1824   :  { %2095 = vmatpush1.msra.mxu0 %v1927_v32  ;;  %2386 = vmatpush2.msra.mxu1 %v2275_v3  ;;  %v2252_v31 = vunpack.c.h.bf16 %v2168_v56  ;;  %v2251_v50 = vunpack.c.l.bf16 %v2168_v56  ;;  %v2167_v32 = vld [vmem:[%s4213_s10 + $0x90] sm:$0xff]  ;;  %v2190_v3 = vld [vmem:[%s4213_s10 + $0x148] sm:$0xff] }
0x1825   :  { %2387 = vmatprep.subr.mxu1 %v2274_v4  ;;  %v2250_v34 = vunpack.c.h.bf16 %v2167_v32  ;;  %v2249_v35 = vunpack.c.l.bf16 %v2167_v32  ;;  %2430 = vmatprep.subr.mxu0 %v2308_v53  ;;  %v2297_v4 = vunpack.c.l.bf16 %v2191_v0  ;;  %v2296_v6 = vunpack.c.h.bf16 %v2190_v3  ;;  %v2211_v56 = vld [vmem:[%s4213_s10 + $0x1f0] sm:$0xff]  ;;  %v2210_v32 = vld [vmem:[%s4213_s10 + $0x1e8] sm:$0xff] }
0x1826   :  { %2388 = vmatpush2.msra.mxu1 %v2273_v5  ;;  %v2189_v5 = vld [vmem:[%s4213_s10 + $0x140] sm:$0xff]  ;;  %v2332_v53 = vunpack.c.h.bf16 %v2208_v38 }
0x1827   :  { %2389 = vmatprep.subr.mxu1 %v2272_v7  ;;  %v2295_v7 = vunpack.c.l.bf16 %v2190_v3  ;;  %v2294_v12 = vunpack.c.h.bf16 %v2189_v5  ;;  %v2202_v3 = vld [vmem:[%s4213_s10 + $0x1a8] sm:$0xff] }
0x1828   :  { %2390 = vmatpush2.msra.mxu1 %v2271_v9  ;;  %v2188_v9 = vld [vmem:[%s4213_s10 + $0x138] sm:$0xff] }
0x1829   :  { %2391 = vmatprep.subr.mxu1 %v2270_v13  ;;  %v2293_v13 = vunpack.c.l.bf16 %v2189_v5  ;;  %v2292_v15 = vunpack.c.h.bf16 %v2188_v9  ;;  %v2201_v5 = vld [vmem:[%s4213_s10 + $0x1a0] sm:$0xff] }
0x182a   :  { %2392 = vmatpush2.msra.mxu1 %v2269_v14  ;;  %v2187_v14 = vld [vmem:[%s4213_s10 + $0x130] sm:$0xff] }
0x182b   :  { %2393 = vmatprep.subr.mxu1 %v2268_v16  ;;  %v2291_v16 = vunpack.c.l.bf16 %v2188_v9  ;;  %v2290_v18 = vunpack.c.h.bf16 %v2187_v14  ;;  %v2200_v9 = vld [vmem:[%s4213_s10 + $0x198] sm:$0xff] }
0x182c   :  { %2394 = vmatpush2.msra.mxu1 %v2267_v17  ;;  %v2186_v17 = vld [vmem:[%s4213_s10 + $0x128] sm:$0xff] }
0x182d   :  { %2395 = vmatprep.subr.mxu1 %v2266_v20  ;;  %v2289_v20 = vunpack.c.l.bf16 %v2187_v14  ;;  %v2288_v22 = vunpack.c.h.bf16 %v2186_v17  ;;  %v2199_v14 = vld [vmem:[%s4213_s10 + $0x190] sm:$0xff] }
0x182e   :  { %2396 = vmatpush2.msra.mxu1 %v2265_v21  ;;  %v2185_v21 = vld [vmem:[%s4213_s10 + $0x120] sm:$0xff] }
0x182f   :  { %2397 = vmatprep.subr.mxu1 %v2264_v23  ;;  %v2287_v23 = vunpack.c.l.bf16 %v2186_v17  ;;  %v2286_v33 = vunpack.c.h.bf16 %v2185_v21  ;;  %v2313_v17 = vunpack.c.l.bf16 %v2199_v14 }
0x1830   :  { %2398 = vmatpush2.msra.mxu1 %v2263_v29  ;;  %v2184_v29 = vld [vmem:[%s4213_s10 + $0x118] sm:$0xff] }
0x1831   :  { %2399 = vmatprep.subr.mxu1 %v2262_v40  ;;  %v2285_v40 = vunpack.c.l.bf16 %v2185_v21  ;;  %v2284_v42 = vunpack.c.h.bf16 %v2184_v29 }
0x1832   :  { %2400 = vmatpush2.msra.mxu1 %v2261_v41  ;;  %v2183_v41 = vld [vmem:[%s4213_s10 + $0x110] sm:$0xff] }
0x1833   :  { %2401 = vmatprep.subr.mxu1 %v2260_v43  ;;  %v2283_v43 = vunpack.c.l.bf16 %v2184_v29  ;;  %v2282_v44 = vunpack.c.h.bf16 %v2183_v41 }
0x1834   :  { %2402 = vmatpush2.msra.mxu1 %v2259_v46  ;;  %v2182_v46 = vld [vmem:[%s4213_s10 + $0x108] sm:$0xff] }
0x1835   :  { %2403 = vmatprep.subr.mxu1 %v2258_v10  ;;  %v2281_v10 = vunpack.c.l.bf16 %v2183_v41  ;;  %v2280_v47 = vunpack.c.h.bf16 %v2182_v46  ;;  %v4090_v41 = vld [vmem:[%s4212_s9] sm:$0xf] }
0x1836   :  { %2404 = vmatpush2.msra.mxu1 %v2257_v49  ;;  %v2181_v49 = vld [vmem:[%s4213_s10 + $0x100] sm:$0xff] }
0x1837   :  { %2405 = vmatprep.subr.mxu1 %v2256_v26  ;;  %v2279_v26 = vunpack.c.l.bf16 %v2182_v46 }
0x1838   :  { %2406 = vmatpush2.msra.mxu1 %v2255_v27  ;;  %v2212_v27 = vld [vmem:[%s4213_s10 + $0x1f8] sm:$0xff] }
0x1839   :  { %2407 = vmatprep.subr.mxu1 %v2254_v11  ;;  %v2278_v11 = vunpack.c.h.bf16 %v2181_v49 }
0x183a   :  { %2408 = vmatpush2.msra.mxu1 %v2253_v28  ;;  %v2277_v28 = vunpack.c.l.bf16 %v2181_v49 }
0x183b   :  { %2409 = vmatprep.subr.mxu1 %v2252_v31  ;;  %v2340_v31 = vunpack.c.h.bf16 %v2212_v27 }
0x183c   :  { %2410 = vmatpush2.msra.mxu1 %v2251_v50  ;;  %v2339_v50 = vunpack.c.l.bf16 %v2212_v27 }
0x183d   :  { %2411 = vmatprep.subr.mxu1 %v2250_v34  ;;  %v2338_v34 = vunpack.c.h.bf16 %v2211_v56 }
0x183e   :  { %2412 = vmatpush2.msra.mxu1 %v2249_v35  ;;  %v2337_v35 = vunpack.c.l.bf16 %v2211_v56  ;;  %v2970_v56 = vld [vmem:[%s4215_s12 + $0x70] sm:$0xff]  }
0x183f   :  { %2413 = vmatprep.subr.mxu1 %v2248_v37  ;;  %v2336_v37 = vunpack.c.h.bf16 %v2210_v32 }
0x1840   :  { %2414 = vmatpush2.msra.mxu1 %v2247_v39  ;;  %v2335_v39 = vunpack.c.l.bf16 %v2210_v32 }
0x1841   :  { %2415 = vmatprep.subr.mxu1 %v2246_v48  ;;  %v2334_v48 = vunpack.c.h.bf16 %v2209_v36 }
0x1842   :  { %2416 = vmatpush2.msra.mxu1 %v2245_v52  ;;  %v2333_v52 = vunpack.c.l.bf16 %v2209_v36  ;;  %v2952_v36 = vunpack.c.h.bf16 %v2970_v56 }
0x187f   :  { %v1910_v54 = vpop.permute.xlu1 %1909 }
0x1880   :  { %1912 = vst.msk [vmem:[#allocation2 + $0xe] sm:$0x3] %vm430_vm5, %v1910_v54  ;;  %v2331_v54 = vunpack.c.l.bf16 %v2208_v38  ;;  %v2951_v38 = vunpack.c.l.bf16 %v2970_v56 }
0x1887   :  { %v3980_v55 = vld [vmem:[#allocation2 + $0x8] sm:$0xff] }
0x1888   :  { %2880 = vmatmul.mubr.msk.f32.gmra.mxu0 %vm1967_vm7, %v3980_v55 }
0x1889   :  { %2128 = vmatprep.mubr.f32.mxu0 %v3328_v25 }
0x188c   :  { %2883 = vmatmul.mubr.msk.f32.vlgmr.msra.gmra.mxu0 %vm1967_vm7, %v3888_v30  ;;  %v2300_v30 = vunpack.c.h.bf16 %v2192_v61 }
0x188d   :  { %2134 = vmatprep.mubr.f32.mxu0 %v3328_v25  ;;  %2431 = vmatpush1.msra.mxu0 %v2307_v57  ;;  %v2330_v57 = vunpack.c.h.bf16 %v2207_v51 }
0x188e   :  { %2432 = vmatprep.subr.mxu0 %v2306_v19  ;;  %v2205_v19 = vld [vmem:[%s4213_s10 + $0x1c0] sm:$0xff] }
0x188f   :  { %2433 = vmatpush1.msra.mxu0 %v2305_v59  ;;  %v2328_v59 = vunpack.c.h.bf16 %v2206_v8  ;;  %v2325_v61 = vunpack.c.l.bf16 %v2205_v19 }
0x1890   :  { %2884 = vmatmul.mubr.msk.f32.gmra.mxu0 %vm1967_vm7, %v3980_v55  ;;  %2434 = vmatprep.subr.mxu0 %v2304_v60  ;;  %v2204_v60 = vld [vmem:[%s4213_s10 + $0x1b8] sm:$0xff] }
0x1891   :  { %2435 = vmatpush1.msra.mxu0 %v2303_v45  ;;  %v2326_v45 = vunpack.c.h.bf16 %v2205_v19  ;;  %v2323_v0 = vunpack.c.l.bf16 %v2204_v60 }
0x1892   :  { %2436 = vmatprep.subr.mxu0 %v2302_v62  ;;  %v2203_v62 = vld [vmem:[%s4213_s10 + $0x1b0] sm:$0xff] }
0x1893   :  { %2437 = vmatpush1.msra.mxu0 %v2301_v63  ;;  %v2324_v63 = vunpack.c.h.bf16 %v2204_v60 }
0x1894   :  { %2438 = vmatprep.subr.mxu0 %v2300_v30  ;;  %v2322_v30 = vunpack.c.h.bf16 %v2203_v62 }
0x1895   :  { %2439 = vmatpush1.msra.mxu0 %v2299_v2  ;;  %v2321_v2 = vunpack.c.l.bf16 %v2203_v62 }
0x1896   :  { %2440 = vmatprep.subr.mxu0 %v2298_v24  ;;  %v2320_v24 = vunpack.c.h.bf16 %v2202_v3 }
0x1897   :  { %2441 = vmatpush1.msra.mxu0 %v2297_v4  ;;  %v2319_v4 = vunpack.c.l.bf16 %v2202_v3 }
0x1898   :  { %2442 = vmatprep.subr.mxu0 %v2296_v6  ;;  %v2318_v6 = vunpack.c.h.bf16 %v2201_v5 }
0x1899   :  { %2443 = vmatpush1.msra.mxu0 %v2295_v7  ;;  %v2317_v7 = vunpack.c.l.bf16 %v2201_v5 }
0x189a   :  { %2444 = vmatprep.subr.mxu0 %v2294_v12  ;;  %v2316_v12 = vunpack.c.h.bf16 %v2200_v9 }
0x189b   :  { %2445 = vmatpush1.msra.mxu0 %v2293_v13  ;;  %v2315_v13 = vunpack.c.l.bf16 %v2200_v9 }
0x189c   :  { %2446 = vmatprep.subr.mxu0 %v2292_v15  ;;  %v2314_v15 = vunpack.c.h.bf16 %v2199_v14 }
0x189d   :  { %2447 = vmatpush1.msra.mxu0 %v2291_v16  ;;  %v1947_v16 = vlaneseq }
0x189e   :  { %2448 = vmatprep.subr.mxu0 %v2290_v18  ;;  %v2198_v18 = vld [vmem:[%s4213_s10 + $0x188] sm:$0xff] }
0x189f   :  { %2449 = vmatpush1.msra.mxu0 %v2289_v20  ;;  %v2312_v20 = vunpack.c.h.bf16 %v2198_v18  ;;  %v2311_v21 = vunpack.c.l.bf16 %v2198_v18  ;;  %v4083_v29 = vshrl.u32 %v1947_v16, 7 }
0x18a0   :  { %2450 = vmatprep.subr.mxu0 %v2288_v22  ;;  %v2197_v22 = vld [vmem:[%s4213_s10 + $0x180] sm:$0xff] }
0x18a1   :  { %2451 = vmatpush1.msra.mxu0 %v2287_v23  ;;  %v2310_v23 = vunpack.c.h.bf16 %v2197_v22  ;;  %v1961_v3 = vsub.s32 3, %v4083_v29 }
0x18a2   :  { %2452 = vmatprep.subr.mxu0 %v2286_v33  ;;  %v2309_v33 = vunpack.c.l.bf16 %v2197_v22 }
0x18a3   :  { %2453 = vmatpush1.msra.mxu0 %v2285_v40  ;;  %v1949_v40 = vsub.s32 0, %v4083_v29  ;;  %v1962_v9 = vrot.slane %v4090_v41, %v1961_v3 }
0x18a4   :  { %2454 = vmatprep.subr.mxu0 %v2284_v42  ;;  %v1953_v42 = vsub.s32 1, %v4083_v29 }
0x18a5   :  { %2455 = vmatpush1.msra.mxu0 %v2283_v43  ;;  %v4096_v43 = vrot.slane %v4090_v41, %v1949_v40 }
0x18a6   :  { %2456 = vmatprep.subr.mxu0 %v2282_v44  ;;  %v4101_v46 = vrot.slane %v4090_v41, %v1953_v42 }
0x18a7   :  { %2457 = vmatpush1.msra.mxu0 %v2281_v10 }
0x18a8   :  { %2458 = vmatprep.subr.mxu0 %v2280_v47 }
0x18a9   :  { %2459 = vmatpush1.msra.mxu0 %v2279_v26 }
0x18aa   :  { %2460 = vmatprep.subr.mxu0 %v2278_v11  ;;  %v2971_v11 = vld [vmem:[%s4215_s12 + $0x78] sm:$0xff]  }
0x18ab   :  { %2461 = vmatpush1.msra.mxu0 %v2277_v28  ;;  %v2963_v28 = vld [vmem:[%s4215_s12 + $0x38] sm:$0xff]   ;;  %v2955_v32 = vunpack.c.l.bf16 %v2971_v11 }
0x18ac   :  { %2462 = vmatprep.subr.mxu0 %v2340_v31  ;;  %v2956_v31 = vunpack.c.h.bf16 %v2971_v11 }
0x18ad   :  { %2463 = vmatpush2.msra.mxu0 %v2339_v50  ;;  %v2924_v50 = vunpack.c.h.bf16 %v2963_v28 }
0x18ae   :  { %2464 = vmatprep.subr.mxu0 %v2338_v34  ;;  %v2962_v34 = vld [vmem:[%s4215_s12 + $0x30] sm:$0xff]   ;;  %3016 = vmatprep.subr.mxu1 %v2956_v31 }
0x18af   :  { %2465 = vmatpush2.msra.mxu0 %v2337_v35  ;;  %v2923_v35 = vunpack.c.l.bf16 %v2963_v28  ;;  %v2957_v28 = vld [vmem:[%s4215_s12 + $0x8] sm:$0xff]  }
0x18b0   :  { %2466 = vmatprep.subr.mxu0 %v2336_v37  ;;  %v2920_v37 = vunpack.c.h.bf16 %v2962_v34  ;;  %v2900_v56 = vunpack.c.h.bf16 %v2957_v28 }
0x18b1   :  { %2467 = vmatpush2.msra.mxu0 %v2335_v39  ;;  %v2969_v39 = vld [vmem:[%s4215_s12 + $0x68] sm:$0xff]  }
0x18b2   :  { %2468 = vmatprep.subr.mxu0 %v2334_v48  ;;  %v2961_v48 = vld [vmem:[%s4215_s12 + $0x28] sm:$0xff]   ;;  %v2948_v51 = vunpack.c.h.bf16 %v2969_v39  ;;  %v2947_v8 = vunpack.c.l.bf16 %v2969_v39 }
0x18b3   :  { %2469 = vmatpush2.msra.mxu0 %v2333_v52  ;;  %v2919_v52 = vunpack.c.l.bf16 %v2962_v34 }
0x18b4   :  { %2470 = vmatprep.subr.mxu0 %v2332_v53  ;;  %v2916_v53 = vunpack.c.h.bf16 %v2961_v48 }
0x18b5   :  { %2471 = vmatpush2.msra.mxu0 %v2331_v54  ;;  %v2968_v54 = vld [vmem:[%s4215_s12 + $0x60] sm:$0xff]  }
0x18b6   :  { %2472 = vmatprep.subr.mxu0 %v2330_v57  ;;  %v2960_v57 = vld [vmem:[%s4215_s12 + $0x20] sm:$0xff]   ;;  %v2944_v19 = vunpack.c.h.bf16 %v2968_v54  ;;  %v2943_v60 = vunpack.c.l.bf16 %v2968_v54 }
0x18b7   :  { %2473 = vmatpush2.msra.mxu0 %v2329_v58  ;;  %v2915_v58 = vunpack.c.l.bf16 %v2961_v48  ;;  %v2341_v48 = vld [vmem:[%s4214_s11] sm:$0x3] }
0x18b8   :  { %2474 = vmatprep.subr.mxu0 %v2328_v59  ;;  %v2912_v59 = vunpack.c.h.bf16 %v2960_v57 }
0x18b9   :  { %2475 = vmatpush2.msra.mxu0 %v2327_v1  ;;  %v2967_v1 = vld [vmem:[%s4215_s12 + $0x58] sm:$0xff]  }
0x18ba   :  { %2476 = vmatprep.subr.mxu0 %v2326_v45  ;;  %v2959_v45 = vld [vmem:[%s4215_s12 + $0x18] sm:$0xff]   ;;  %v2940_v62 = vunpack.c.h.bf16 %v2967_v1 }
0x18bb   :  { %2477 = vmatpush2.msra.mxu0 %v2325_v61  ;;  %v2911_v61 = vunpack.c.l.bf16 %v2960_v57 }
0x18bc   :  { %2478 = vmatprep.subr.mxu0 %v2324_v63  ;;  %v2908_v63 = vunpack.c.h.bf16 %v2959_v45 }
0x18bd   :  { %2479 = vmatpush2.msra.mxu0 %v2323_v0  ;;  %v2939_v0 = vunpack.c.l.bf16 %v2967_v1 }
0x18be   :  { %2480 = vmatprep.subr.mxu0 %v2322_v30  ;;  %v2907_v30 = vunpack.c.l.bf16 %v2959_v45 }
0x18bf   :  { %2481 = vmatpush2.msra.mxu0 %v2321_v2  ;;  %v1957_v2 = vsub.s32 2, %v4083_v29 }
0x18c0   :  { %2482 = vmatprep.subr.mxu0 %v2320_v24 }
0x18c1   :  { %2483 = vmatpush2.msra.mxu0 %v2319_v4 }
0x18c2   :  { %2484 = vmatprep.subr.mxu0 %v2318_v6  ;;  %v1958_v6 = vrot.slane %v4090_v41, %v1957_v2  ;;  %v2966_v41 = vld [vmem:[%s4215_s12 + $0x50] sm:$0xff]  }
0x18c3   :  { %2485 = vmatpush2.msra.mxu0 %v2317_v7 }
0x18c4   :  { %2486 = vmatprep.subr.mxu0 %v2316_v12 }
0x18c5   :  { %2487 = vmatpush2.msra.mxu0 %v2315_v13 }
0x18c6   :  { %2488 = vmatprep.subr.mxu0 %v2314_v15 }
0x18c7   :  { %2489 = vmatpush2.msra.mxu0 %v2313_v17 }
0x18c8   :  { %2490 = vmatprep.subr.mxu0 %v2312_v20 }
0x18c9   :  { %2491 = vmatpush2.msra.mxu0 %v2311_v21 }
0x18ca   :  { %2492 = vmatprep.subr.mxu0 %v2310_v23 }
0x18cb   :  { %2493 = vmatpush2.msra.mxu0 %v2309_v33 }
0x18cc   :  { %3152 = vmatprep.subr.mxu0 %v3328_v25 }
0x18db   :  { %v2053_v44 = vpop.f32.mrf.mxu0 }
0x18dc   :  { %v2054_v10 = vadd.f32 %v2053_v44, %v4096_v43  ;;  %v2936_v44 = vunpack.c.h.bf16 %v2966_v41 }
0x18dd   :  { %v2055_v49 = vpop.f32.mrf.mxu0 }
0x18de   :  { %v2056_v47 = vadd.f32 %v2055_v49, %v4101_v46  ;;  %v2141_v27 = vmax.f32 %v2054_v10, 0.0  ;;  %v2958_v10 = vld [vmem:[%s4215_s12 + $0x10] sm:$0xff]  }
0x18df   :  { %v2904_v49 = vunpack.c.h.bf16 %v2958_v10 }
0x18e0   :  { %v2142_v26 = vmax.f32 %v2056_v47, 0.0  ;;  %v2935_v47 = vunpack.c.l.bf16 %v2966_v41 }
0x18e2   :  { %2417 = vmatprep.mubr.f32.mxu1 %v2142_v26  ;;  %v2903_v26 = vunpack.c.l.bf16 %v2958_v10 }
0x18e3   :  { %2418 = vmatmul.mubr.f32.vlgmr.msra.gmra.mxu1 %v2141_v27  ;;  %v2965_v27 = vld [vmem:[%s4215_s12 + $0x48] sm:$0xff]  }
0x18e4   :  { %3017 = vmatpush3.msra.mxu1 %v2924_v50  ;;  %v2932_v11 = vunpack.c.h.bf16 %v2965_v27  ;;  %v2931_v31 = vunpack.c.l.bf16 %v2965_v27  ;;  %v2899_v50 = vunpack.c.l.bf16 %v2957_v28 }
0x18e5   :  { %3018 = vmatprep.subr.mxu1 %v2955_v32  ;;  %v2964_v32 = vld [vmem:[%s4215_s12 + $0x40] sm:$0xff]  }
0x18e6   :  { %3019 = vmatpush3.msra.mxu1 %v2923_v35  ;;  %v2928_v34 = vunpack.c.h.bf16 %v2964_v32  ;;  %v2894_v35 = vld [vmem:[%s4215_s12] sm:$0xff]  }
0x18e7   :  { %3020 = vmatprep.subr.mxu1 %v2952_v36  ;;  %v2896_v36 = vunpack.c.h.bf16 %v2894_v35  ;;  %v2895_v39 = vunpack.c.l.bf16 %v2894_v35  ;;  %v2681_v35 = vld [vmem:[%s4205_s2] sm:$0xff] }
0x18e8   :  { %3021 = vmatpush3.msra.mxu1 %v2920_v37  ;;  %v2927_v37 = vunpack.c.l.bf16 %v2964_v32 }
0x18e9   :  { %3022 = vmatprep.subr.mxu1 %v2951_v38 }
0x18ea   :  { %3023 = vmatpush3.msra.mxu1 %v2919_v52  ;;  %v2346_v52 = vrot.slane %v2341_v48, %v1949_v40 }
0x18eb   :  { %3024 = vmatprep.subr.mxu1 %v2948_v51 }
0x18ec   :  { %3025 = vmatpush3.msra.mxu1 %v2916_v53  ;;  %v2350_v53 = vrot.slane %v2341_v48, %v1953_v42 }
0x18ed   :  { %3026 = vmatprep.subr.mxu1 %v2947_v8 }
0x18ee   :  { %3027 = vmatpush3.msra.mxu1 %v2915_v58 }
0x18ef   :  { %3028 = vmatprep.subr.mxu1 %v2944_v19 }
0x18f0   :  { %3029 = vmatpush3.msra.mxu1 %v2912_v59 }
0x18f1   :  { %3030 = vmatprep.subr.mxu1 %v2943_v60 }
0x18f2   :  { %3031 = vmatpush3.msra.mxu1 %v2911_v61 }
0x18f3   :  { %3032 = vmatprep.subr.mxu1 %v2940_v62 }
0x18f4   :  { %3033 = vmatpush3.msra.mxu1 %v2908_v63 }
0x18f5   :  { %3034 = vmatprep.subr.mxu1 %v2939_v0 }
0x18f6   :  { %3035 = vmatpush3.msra.mxu1 %v2907_v30 }
0x18f7   :  { %3036 = vmatprep.subr.mxu1 %v2936_v44 }
0x18f8   :  { %3037 = vmatpush3.msra.mxu1 %v2904_v49 }
0x18f9   :  { %3038 = vmatprep.subr.mxu1 %v2935_v47 }
0x18fa   :  { %3039 = vmatpush3.msra.mxu1 %v2903_v26 }
0x18fb   :  { %3040 = vmatprep.subr.mxu1 %v2932_v11 }
0x18fc   :  { %3041 = vmatpush3.msra.mxu1 %v2900_v56 }
0x18fd   :  { %3042 = vmatprep.subr.mxu1 %v2931_v31 }
0x18fe   :  { %3043 = vmatpush3.msra.mxu1 %v2899_v50 }
0x18ff   :  { %3044 = vmatprep.subr.mxu1 %v2928_v34 }
0x1900   :  { %3045 = vmatpush3.msra.mxu1 %v2896_v36  ;;  %v2682_v36 = vld [vmem:[%s4205_s2 + $0x8] sm:$0xff] }
0x1901   :  { %3046 = vmatprep.subr.mxu1 %v2927_v37 }
0x1902   :  { %3047 = vmatpush3.msra.mxu1 %v2895_v39 }
0x1948   :  { %v2059_v24 = vpop.f32.mrf.mxu0 }
0x1949   :  { %v2060_v4 = vadd.f32 %v2059_v24, %v4096_v43  ;;  %v2885_v24 = vld [vmem:[%s4216_s13] ss:$0 sm:$0xff] }
0x194a   :  { %v2061_v5 = vpop.f32.mrf.mxu0 }
0x194b   :  { %v2062_v7 = vadd.f32 %v2061_v5, %v4101_v46  ;;  %v2145_v14 = vmax.f32 %v2060_v4, 0.0 }
0x194c   :  { %v2130_v12 = vpop.f32.mrf.mxu0 }
0x194d   :  { %v2146_v13 = vmax.f32 %v2062_v7, 0.0  ;;  %v2131_v15 = vadd.f32 %v2130_v12, %v1958_v6  ;;  %v2886_v12 = vld [vmem:[%s4217_s14] ss:$0 sm:$0xff] }
0x194e   :  { %v2132_v16 = vpop.f32.mrf.mxu0 }
0x194f   :  { %v2133_v17 = vadd.f32 %v2132_v16, %v1962_v9  ;;  %2423 = vmatprep.mubr.f32.mxu1 %v2146_v13  ;;  %v2143_v21 = vmax.f32 %v2131_v15, 0.0 }
0x1950   :  { %v2136_v18 = vpop.f32.mrf.mxu0  ;;  %2424 = vmatmul.mubr.f32.gmra.mxu1 %v2145_v14 }
0x1951   :  { %v2144_v20 = vmax.f32 %v2133_v17, 0.0  ;;  %v2137_v22 = vadd.f32 %v2136_v18, %v1958_v6 }
0x1952   :  { %v2138_v23 = vpop.f32.mrf.mxu0 }
0x1953   :  { %v2139_v33 = vadd.f32 %v2138_v23, %v1962_v9  ;;  %2494 = vmatprep.mubr.f32.mxu0 %v2144_v20  ;;  %v2147_v46 = vmax.f32 %v2137_v22, 0.0  ;;  %v3330_v20 = vmov 0  }
0x1954   :  { %2495 = vmatmul.mubr.f32.vlgmr.msra.gmra.mxu0 %v2143_v21  ;;  %3166 = vset.pattern.permute.xlu1 %v3330_v20  ;;  %v2887_v21 = vld [vmem:[#allocation3] ss:$0 sm:$0xff] }
0x1955   :  { %v2148_v43 = vmax.f32 %v2139_v33, 0.0  ;;  %3165 = vset.pattern.permute.xlu0 %v3330_v20 }
0x1957   :  { %2500 = vmatprep.mubr.f32.mxu0 %v2148_v43 }
0x1958   :  { %2501 = vmatmul.mubr.f32.gmra.mxu0 %v2147_v46 }
0x1959   :  { %3156 = vmatprep.mubr.msk.f32.mxu0 %vm3329_vm1, %v3328_v25 }
0x19a3   :  { %v2419_v38 = vpop.f32.mrf.mxu1 }
0x19a4   :  { %v2420_v8 = vadd.f32 %v2419_v38, %v2346_v52 }
0x19a5   :  { %v2421_v51 = vpop.f32.mrf.mxu1 }
0x19a6   :  { %v2422_v58 = vadd.f32 %v2421_v51, %v2350_v53 }
0x1a10   :  { %v2425_v54 = vpop.f32.mrf.mxu1 }
0x1a11   :  { %v2426_v45 = vadd.f32 %v2425_v54, %v2346_v52 }
0x1a12   :  { %v2427_v19 = vpop.f32.mrf.mxu1 }
0x1a13   :  { %v2428_v62 = vadd.f32 %v2427_v19, %v2350_v53 }
0x1a14   :  { %v2496_v57 = vpop.f32.mrf.mxu0 }
0x1a15   :  { %v2497_v59 = vadd.f32 %v2496_v57, %v2420_v8 }
0x1a16   :  { %v2498_v1 = vpop.f32.mrf.mxu0 }
0x1a17   :  { %v2499_v60 = vadd.f32 %v2498_v1, %v2422_v58  ;;  %v2507_v0 = vmax.f32 %v2497_v59, 0.0 }
0x1a18   :  { %v2502_v61 = vpop.f32.mrf.mxu0 }
0x1a19   :  { %v2508_v63 = vmax.f32 %v2499_v60, 0.0  ;;  %v2503_v30 = vadd.f32 %v2502_v61, %v2426_v45 }
0x1a1a   :  { %v2504_v2 = vpop.f32.mrf.mxu0 }
0x1a1b   :  { %v2505_v40 = vadd.f32 %v2504_v2, %v2428_v62  ;;  %2646 = vmatprep.mubr.f32.mxu1 %v2508_v63  ;;  %v2509_v42 = vmax.f32 %v2503_v30, 0.0 }
0x1a1c   :  { %2647 = vmatmul.mubr.f32.vlgmr.msra.gmra.mxu1 %v2507_v0 }
0x1a1d   :  { %v2510_v29 = vmax.f32 %v2505_v40, 0.0 }
0x1a1f   :  { %2651 = vmatprep.mubr.f32.mxu1 %v2510_v29 }
0x1a20   :  { %2652 = vmatmul.mubr.f32.gmra.mxu1 %v2509_v42 }
0x1adc   :  { %v3048_v3 = vpop.f32.mrf.mxu1 }
0x1ade   :  { %v3049_v4 = vpop.f32.mrf.mxu1 }
0x1adf   :  { %v3050_v5 = vadd.f32 %v3049_v4, %v3048_v3 }
0x1ae0   :  { %v3051_v6 = vpop.f32.mrf.mxu1 }
0x1ae1   :  { %v2649_v7 = vadd.f32 %v3050_v5, %v2885_v24  ;;  %v2733_v5 = vld [vmem:[%s4206_s3] sm:$0x3] }
0x1ae2   :  { %v3052_v9 = vpop.f32.mrf.mxu1 }
0x1ae3   :  { %v2657_v13 = vmax.f32 %v2649_v7, 0.0  ;;  %v3053_v14 = vadd.f32 %v3052_v9, %v3051_v6 }
0x1ae5   :  { %v2654_v15 = vadd.f32 %v3053_v14, %v2885_v24  ;;  %v2666_v16 = vmul.f32 %v2886_v12, %v2657_v13  ;;  %v3303_v24 = vld [vmem:[#allocation2] sm:$0xff] }
0x1ae7   :  { %v2658_v17 = vmax.f32 %v2654_v15, 0.0  ;;  %2668 = vadd.xlane.f32.xlu0 %v2666_v16 }
0x1ae9   :  { %v2667_v18 = vmul.f32 %v2886_v12, %v2658_v17 }
0x1aeb   :  { %2670 = vadd.xlane.f32.xlu1 %v2667_v18 }
0x1b70   :  { %v2669_v22 = vpop.xlane.xlu0 %2668 }
0x1b71   :  { %v2679_v23 = vadd.f32 %v2887_v21, %v2669_v22 }
0x1b73   :  { %v2684_v46 = vsel %vm2683_vm8, %v2679_v23, -inf }
0x1b74   :  { %v2671_v33 = vpop.xlane.xlu1 %2670 }
0x1b75   :  { %v2680_v43 = vadd.f32 %v2887_v21, %v2671_v33 }
0x1b77   :  { %v2685_v41 = vsel %vm2683_vm8, %v2680_v43, -inf }
0x1b78   :  { %v2686_v44 = vmax.f32 %v2684_v46, %v2685_v41 }
0x1b7a   :  { %v2687_v10 = vrot.slane %v2686_v44, 4 }
0x1b7c   :  { %v2688_v49 = vmax.f32 %v2686_v44, %v2687_v10 }
0x1b7e   :  { %v2689_v47 = vrot.slane %v2688_v49, 2 }
0x1b80   :  { %v2690_v26 = vmax.f32 %v2688_v49, %v2689_v47 }
0x1b82   :  { %v2691_v27 = vrot.slane %v2690_v26, 1 }
0x1b84   :  { %v2692_v11 = vmax.f32 %v2690_v26, %v2691_v27 }
0x1b86   :  { %v2693_v28 = vsub.f32 %v2679_v23, %v2692_v11  ;;  %v2694_v56 = vsub.f32 %v2680_v43, %v2692_v11 }
0x1b88   :  { %v2695_v31 = vmul.f32 1.442695, %v2693_v28  ;;  %v2697_v50 = vmul.f32 1.442695, %v2694_v56 }
0x1b8a   :  { %3295 = vpow2.f32 %v2695_v31 }
0x1b8b   :  { %3297 = vpow2.f32 %v2697_v50 }
0x1b97   :  { %v3296_v32 = vpop.eup %3295 }
0x1b98   :  { %v3298_v34 = vpop.eup %3297  ;;  %2701 = vperm.xlu0 %3165, %v3296_v32  }
0x1b99   :  { %2706 = vperm.xlu1 %3166, %v3298_v34  }
0x1c13   :  { %v2702_v37 = vpop.permute.xlu0 %2701 }
0x1c14   :  { %v2707_v39 = vpop.permute.xlu1 %2706  ;;  %v2709_v38 = vmul.f32 %v2702_v37, %v2681_v35 }
0x1c15   :  { %v2710_v48 = vmul.f32 %v2707_v39, %v2682_v36 }
0x1c16   :  { %v2712_v52 = vsel %vm2711_vm9, %v2709_v38, 0.0 }
0x1c17   :  { %v2713_v51 = vsel %vm2711_vm9, %v2710_v48, 0.0 }
0x1c18   :  { %v2714_v53 = vadd.f32 %v2713_v51, %v2712_v52 }
0x1c1a   :  { %v2715_v54 = vrot.slane %v2714_v53, 4 }
0x1c1c   :  { %v2716_v8 = vadd.f32 %v2715_v54, %v2714_v53 }
0x1c1e   :  { %v2717_v57 = vrot.slane %v2716_v8, 2 }
0x1c20   :  { %v2718_v58 = vadd.f32 %v2717_v57, %v2716_v8 }
0x1c22   :  { %v2719_v19 = vrot.slane %v2718_v58, 1 }
0x1c24   :  { %v2720_v59 = vadd.f32 %v2719_v19, %v2718_v58 }
0x1c26   :  { %v2722_v1 = vmul.f32 %v2720_v59, %v2682_v36  ;;  %v2721_v60 = vmul.f32 %v2720_v59, %v2681_v35 }
0x1c28   :  { %v2726_v45 = vsel %vm2711_vm9, %v2722_v1, 0.0  ;;  %v2723_v61 = vsel %vm2711_vm9, %v2721_v60, 0.0 }
0x1c29   :  { %2727 = vadd.xlane.f32.xlu1 %v2726_v45  ;;  %2724 = vadd.xlane.f32.xlu0 %v2723_v61 }
0x1cb2   :  { %v2728_v62 = vpop.xlane.xlu1 %2727  ;;  %v2725_v63 = vpop.xlane.xlu0 %2724 }
0x1cb3   :  { %3299 = vrcp.f32 %v2728_v62 }
0x1cb4   :  { %3301 = vrcp.f32 %v2725_v63 }
0x1cc0   :  { %v3300_v0 = vpop.eup %3299 }
0x1cc1   :  { %v3302_v30 = vpop.eup %3301  ;;  %v2732_v2 = vmul.f32 %v3300_v0, %v3298_v34 }
0x1cc2   :  { %v2731_v40 = vmul.f32 %v3302_v30, %v3296_v32 }
0x1cc3   :  { %2741 = vperm.xlu1 %3166, %v2732_v2   ;;  %2822 = vst.msk [vmem:[%s4220_s17 + $0x8] sm:$0xff] %vm2683_vm8, %v2732_v2 }
0x1cc4   :  { %2736 = vperm.xlu0 %3165, %v2731_v40   ;;  %2821 = vst.msk [vmem:[%s4220_s17] sm:$0xff] %vm2683_vm8, %v2731_v40  ;;  %s3304_s17 = scalar_lea.vmem %s2830_s22, 32 }
0x1cc5   :  { %p3305_p0 = scmp.ne.s32.totalorder %s2830_s22, %s3304_s17  ;;  %p3310_p2 = scmp.lt.s32.totalorder %s3304_s17, %s3304_s17 }
0x1cc7   :  { %p3311_p3 = por %p3310_p2, %p3309_p1 }
0x1cc9   :  { %p3312_p4 = pnand %p3311_p3, %p3305_p0 }
0x1d3e   :  { %v2742_v29 = vpop.permute.xlu1 %2741 }
0x1d3f   :  { %v2745_v42 = vmul.f32 %v2742_v29, %v3980_v55  ;;  %v2737_v3 = vpop.permute.xlu0 %2736 }
0x1d40   :  { %v2744_v4 = vmul.f32 %v3303_v24, %v2737_v3 }
0x1d41   :  { %3153 = vmatpush3.msra.mxu0 %v2745_v42 }
0x1d42   :  { %3154 = vmatprep.subr.mxu0 %v3328_v25 }
0x1d43   :  { %3155 = vmatpush3.msra.mxu0 %v2744_v4 }
0x1d44   :  { %3157 = vmatmul.mubr.msk.f32.vlgmr.msra.gmra.mxu0 %vm84_vm0, %v2733_v5 }
0x1e04   :  { %v2815_v6 = vpop.f32.mrf.mxu0 }
0x1e05   :  { %2820 = vst.msk [vmem:[#allocation4] sm:$0x3] %vm2819_vm10, %v2815_v6 }
0x1e06   :  { %v3158_v55 = vpop.f32.mrf.mxu0 }
0x1e07   :  { %3315 = shalt.err (!%p3312_p4)
}
0x1e08   :  { %2832 = dma.vmem_to_hbm [thread:$0]  %s2830_s22, 32, %s4219_s16, [#allocation5]  }
0x1e09   :  { %3324 = dma.done.wait [#allocation5], 32  }
0x1e0a   :  { %3325 = vsyncadd [#allocation5], 4294967264 }
0x1e0b   :  { %2840 = vsyncpa [#allocation5], 1 }

</bundles_post_ra>
